<compile_context>
chip_gen: v6e
topology: v6e:2x2x1
jax: 0.10.0
libtpu: 0.0.40
codegen_flags: <defaults>
</compile_context>

<pallas_src>
import math

import jax
import jax.numpy as jnp
from jax.experimental import pallas as pl
from jax.experimental.pallas import tpu as pltpu


def _round_up(v, m):
    return (v + m - 1) // m * m


def _make_kernel(K2, kw, W, HWo, has_bias):
    def kernel(*refs):
        if has_bias:
            x_ref, w_ref, b_ref, o_ref = refs
        else:
            x_ref, w_ref, o_ref = refs
        x = x_ref[...].astype(jnp.float32)              # (C, HWpad)
        O = o_ref.shape[0]
        acc = jnp.zeros((O, HWo), jnp.float32)
        # K^2 is small -> static unroll; slice offsets stay static (cheap lane shifts,
        # no dynamic-index relayout).
        for p in range(K2):
            s = (p // kw) * W + (p % kw)
            xs = x[:, s:s + HWo]                        # (C, HWo) shifted view of the image
            wp = w_ref[p].astype(jnp.float32)           # (O, C, HWo)
            acc = acc + jnp.sum(xs[None, :, :] * wp, axis=1)
        if has_bias:
            acc = acc + b_ref[...].astype(jnp.float32)
        o_ref[...] = acc.astype(o_ref.dtype)
    return kernel


def locally_connected_2d(x, weight, bias=None, stride=(1, 1)):
    """x: (N, C, H, W); weight: (1, O, C, oh, ow, K^2); bias: (1, O, oh, ow) or None."""
    N, C, H, W = x.shape
    _, O, Cw, oh, ow, K2 = weight.shape
    assert Cw == C
    k = int(round(math.sqrt(K2)))
    assert k * k == K2, "LocallyConnected2d assumes a square kernel"
    kh = kw = k
    dh, dw = stride
    assert oh == (H - kh) // dh + 1 and ow == (W - kw) // dw + 1, \
        "weight output_size must match the unfolded spatial size"

    HW = H * W
    HWo = _round_up(HW, 128)                  # lane-dense output width (multiple of 128)
    max_s = (kh - 1) * W + (kw - 1)           # largest in-kernel shift
    HWpad = _round_up(HWo + max_s, 128)       # x slab width incl. slice margin

    # x: flat row-major image, zero lane padding. No K^2 inflation, no transpose copy.
    x_k = jnp.pad(x.reshape(N, C, HW), ((0, 0), (0, 0), (0, HWpad - HW)))

    # weight: (1,O,C,oh,ow,K2) -> (K2,O,C,oh,ow), scattered onto the padded image grid.
    # (One-time parameter relayout; in a real model this is done once at load time.)
    row_sl = slice(0, (oh - 1) * dh + 1, dh)
    col_sl = slice(0, (ow - 1) * dw + 1, dw)
    w_t = jnp.transpose(weight[0], (4, 0, 1, 2, 3))               # (K2, O, C, oh, ow)
    w_img = jnp.zeros((K2, O, C, H, W), dtype=weight.dtype)
    w_img = w_img.at[:, :, :, row_sl, col_sl].set(w_t)
    w_k = jnp.pad(w_img.reshape(K2, O, C, HW),
                  ((0, 0), (0, 0), (0, 0), (0, HWo - HW)))

    has_bias = bias is not None
    inputs = [x_k, w_k]
    in_specs = [
        pl.BlockSpec((None, C, HWpad), lambda n: (n, 0, 0)),
        pl.BlockSpec((K2, O, C, HWo), lambda n: (0, 0, 0, 0)),    # grid-invariant -> resident
    ]
    if has_bias:
        b_img = jnp.zeros((O, H, W), dtype=bias.dtype)
        b_img = b_img.at[:, row_sl, col_sl].set(bias[0])
        b_k = jnp.pad(b_img.reshape(O, HW), ((0, 0), (0, HWo - HW)))
        inputs.append(b_k)
        in_specs.append(pl.BlockSpec((O, HWo), lambda n: (0, 0)))

    itemsize = x.dtype.itemsize
    cost = pl.CostEstimate(
        flops=2 * N * O * C * K2 * oh * ow,
        transcendentals=0,
        bytes_accessed=(x_k.size + w_k.size + N * O * HWo
                        + (O * HWo if has_bias else 0)) * itemsize,
    )

    out_flat = pl.pallas_call(
        _make_kernel(K2, kw, W, HWo, has_bias),
        out_shape=jax.ShapeDtypeStruct((N, O, HWo), x.dtype),
        grid=(N,),
        in_specs=in_specs,
        out_specs=pl.BlockSpec((None, O, HWo), lambda n: (n, 0, 0)),
        compiler_params=pltpu.CompilerParams(
            dimension_semantics=("parallel",),
            vmem_limit_bytes=32 * 1024 * 1024,
        ),
        cost_estimate=cost,
    )(*inputs)

    # Valid outputs live at image coords (i*dh, j*dw); padded / unused lanes are dropped.
    out = out_flat[:, :, :HW].reshape(N, O, H, W)[:, :, row_sl, col_sl]
    return out


# ----------------------------- pure-JAX reference -----------------------------
def _extract_patches(x, kh, kw, dh, dw):
    N, C, H, W = x.shape
    oh = (H - kh) // dh + 1
    ow = (W - kw) // dw + 1
    rows = []
    for a in range(kh):
        cols = []
        for b in range(kw):
            cols.append(x[:, :, a:a + dh * (oh - 1) + 1:dh, b:b + dw * (ow - 1) + 1:dw])
        rows.append(jnp.stack(cols, axis=-1))          # (N, C, oh, ow, kw)
    patches = jnp.stack(rows, axis=-2)                 # (N, C, oh, ow, kh, kw)
    return patches.reshape(N, C, oh, ow, kh * kw), oh, ow


def _ref_forward(x, weight, bias, stride):
    _, O, C, oh, ow, K2 = weight.shape
    k = int(round(math.sqrt(K2)))
    patches, _, _ = _extract_patches(x, k, k, stride[0], stride[1])  # (N, C, oh, ow, K2)
    out = jnp.sum(patches[:, None] * weight, axis=(2, -1))           # (N, O, oh, ow)
    if bias is not None:
        out = out + bias
    return out


if __name__ == "__main__":
    # LocallyConnected2d(in_channels=4, out_channels=4, output_size=14,
    #                    kernel_size=3, stride=1, bias=False)
    N, C, H, W = 2, 4, 16, 16
    O = 4
    k = 3
    stride = (1, 1)
    oh = (H - k) // stride[0] + 1
    ow = (W - k) // stride[1] + 1

    key = jax.random.PRNGKey(0)
    kx, kw_key, kb_key = jax.random.split(key, 3)
    x = jax.random.normal(kx, (N, C, H, W), dtype=jnp.float32)
    weight = jax.random.normal(kw_key, (1, O, C, oh, ow, k * k), dtype=jnp.float32)

    # Module default: bias=False
    out = jax.block_until_ready(locally_connected_2d(x, weight, bias=None, stride=stride))
    ref = _ref_forward(x, weight, None, stride)
    assert out.shape == (N, O, oh, ow)
    assert jnp.allclose(out, ref, atol=1e-4, rtol=1e-4), "mismatch vs reference (no bias)"

    # Fused-bias path
    bias = jax.random.normal(kb_key, (1, O, oh, ow), dtype=jnp.float32)
    out_b = jax.block_until_ready(locally_connected_2d(x, weight, bias=bias, stride=stride))
    ref_b = _ref_forward(x, weight, bias, stride)
    assert jnp.allclose(out_b, ref_b, atol=1e-4, rtol=1e-4), "mismatch vs reference (bias)"

    print("KERNEL_OK")
</pallas_src>

<mosaic_0001>
module attributes {stable_mosaic.version = 11 : i64} {
  func.func @kernel(%arg0: i32, %arg1: memref<1x4x384xf32, #tpu.memory_space<vmem>>, %arg2: memref<9x4x4x256xf32, #tpu.memory_space<vmem>>, %arg3: memref<1x4x256xf32, #tpu.memory_space<vmem>>) attributes {dimension_semantics = [#tpu.dimension_semantics<parallel>], iteration_bounds = array<i64: 2>, scalar_prefetch = 0 : i64, scratch_operands = 0 : i64, tpu.core_type = #tpu.core_type<tc>, window_params = [{transform_indices = @transform_0, window_bounds = array<i64: 1, 4, 384>}, {pipeline_mode = #tpu.pipeline_mode<synchronous>, transform_indices = @transform_1, window_bounds = array<i64: 9, 4, 4, 256>}, {transform_indices = @transform_2, window_bounds = array<i64: 1, 4, 256>}]} {
    %c0 = arith.constant 0 : index
    %c0_0 = arith.constant 0 : index
    %c0_1 = arith.constant 0 : index
    %0 = vector.load %arg1[%c0, %c0_0, %c0_1] : memref<1x4x384xf32, #tpu.memory_space<vmem>>, vector<1x4x384xf32>
    %1 = vector.shape_cast %0 : vector<1x4x384xf32> to vector<4x384xf32>
    %cst = arith.constant 0.000000e+00 : f32
    %2 = vector.broadcast %cst : f32 to vector<4x256xf32>
    %3 = vector.extract_strided_slice %1 {offsets = [0, 0], sizes = [4, 256], strides = [1, 1]} : vector<4x384xf32> to vector<4x256xf32>
    %c0_2 = arith.constant 0 : index
    %c0_3 = arith.constant 0 : index
    %c0_4 = arith.constant 0 : index
    %c0_5 = arith.constant 0 : index
    %4 = vector.load %arg2[%c0_2, %c0_3, %c0_4, %c0_5] : memref<9x4x4x256xf32, #tpu.memory_space<vmem>>, vector<1x4x4x256xf32>
    %5 = vector.shape_cast %4 : vector<1x4x4x256xf32> to vector<4x4x256xf32>
    %6 = vector.shape_cast %3 : vector<4x256xf32> to vector<1x4x256xf32>
    %7 = vector.broadcast %6 : vector<1x4x256xf32> to vector<4x4x256xf32>
    %8 = arith.mulf %7, %5 : vector<4x4x256xf32>
    %cst_6 = arith.constant dense<0.000000e+00> : vector<4x256xf32>
    %9 = vector.multi_reduction <add>, %8, %cst_6 [1] : vector<4x4x256xf32> to vector<4x256xf32>
    %10 = arith.addf %2, %9 : vector<4x256xf32>
    %11 = vector.extract_strided_slice %1 {offsets = [0, 1], sizes = [4, 256], strides = [1, 1]} : vector<4x384xf32> to vector<4x256xf32>
    %c1 = arith.constant 1 : index
    %c0_7 = arith.constant 0 : index
    %c0_8 = arith.constant 0 : index
    %c0_9 = arith.constant 0 : index
    %12 = vector.load %arg2[%c1, %c0_7, %c0_8, %c0_9] : memref<9x4x4x256xf32, #tpu.memory_space<vmem>>, vector<1x4x4x256xf32>
    %13 = vector.shape_cast %12 : vector<1x4x4x256xf32> to vector<4x4x256xf32>
    %14 = vector.shape_cast %11 : vector<4x256xf32> to vector<1x4x256xf32>
    %15 = vector.broadcast %14 : vector<1x4x256xf32> to vector<4x4x256xf32>
    %16 = arith.mulf %15, %13 : vector<4x4x256xf32>
    %cst_10 = arith.constant dense<0.000000e+00> : vector<4x256xf32>
    %17 = vector.multi_reduction <add>, %16, %cst_10 [1] : vector<4x4x256xf32> to vector<4x256xf32>
    %18 = arith.addf %10, %17 : vector<4x256xf32>
    %19 = vector.extract_strided_slice %1 {offsets = [0, 2], sizes = [4, 256], strides = [1, 1]} : vector<4x384xf32> to vector<4x256xf32>
    %c2 = arith.constant 2 : index
    %c0_11 = arith.constant 0 : index
    %c0_12 = arith.constant 0 : index
    %c0_13 = arith.constant 0 : index
    %20 = vector.load %arg2[%c2, %c0_11, %c0_12, %c0_13] : memref<9x4x4x256xf32, #tpu.memory_space<vmem>>, vector<1x4x4x256xf32>
    %21 = vector.shape_cast %20 : vector<1x4x4x256xf32> to vector<4x4x256xf32>
    %22 = vector.shape_cast %19 : vector<4x256xf32> to vector<1x4x256xf32>
    %23 = vector.broadcast %22 : vector<1x4x256xf32> to vector<4x4x256xf32>
    %24 = arith.mulf %23, %21 : vector<4x4x256xf32>
    %cst_14 = arith.constant dense<0.000000e+00> : vector<4x256xf32>
    %25 = vector.multi_reduction <add>, %24, %cst_14 [1] : vector<4x4x256xf32> to vector<4x256xf32>
    %26 = arith.addf %18, %25 : vector<4x256xf32>
    %27 = vector.extract_strided_slice %1 {offsets = [0, 16], sizes = [4, 256], strides = [1, 1]} : vector<4x384xf32> to vector<4x256xf32>
    %c3 = arith.constant 3 : index
    %c0_15 = arith.constant 0 : index
    %c0_16 = arith.constant 0 : index
    %c0_17 = arith.constant 0 : index
    %28 = vector.load %arg2[%c3, %c0_15, %c0_16, %c0_17] : memref<9x4x4x256xf32, #tpu.memory_space<vmem>>, vector<1x4x4x256xf32>
    %29 = vector.shape_cast %28 : vector<1x4x4x256xf32> to vector<4x4x256xf32>
    %30 = vector.shape_cast %27 : vector<4x256xf32> to vector<1x4x256xf32>
    %31 = vector.broadcast %30 : vector<1x4x256xf32> to vector<4x4x256xf32>
    %32 = arith.mulf %31, %29 : vector<4x4x256xf32>
    %cst_18 = arith.constant dense<0.000000e+00> : vector<4x256xf32>
    %33 = vector.multi_reduction <add>, %32, %cst_18 [1] : vector<4x4x256xf32> to vector<4x256xf32>
    %34 = arith.addf %26, %33 : vector<4x256xf32>
    %35 = vector.extract_strided_slice %1 {offsets = [0, 17], sizes = [4, 256], strides = [1, 1]} : vector<4x384xf32> to vector<4x256xf32>
    %c4 = arith.constant 4 : index
    %c0_19 = arith.constant 0 : index
    %c0_20 = arith.constant 0 : index
    %c0_21 = arith.constant 0 : index
    %36 = vector.load %arg2[%c4, %c0_19, %c0_20, %c0_21] : memref<9x4x4x256xf32, #tpu.memory_space<vmem>>, vector<1x4x4x256xf32>
    %37 = vector.shape_cast %36 : vector<1x4x4x256xf32> to vector<4x4x256xf32>
    %38 = vector.shape_cast %35 : vector<4x256xf32> to vector<1x4x256xf32>
    %39 = vector.broadcast %38 : vector<1x4x256xf32> to vector<4x4x256xf32>
    %40 = arith.mulf %39, %37 : vector<4x4x256xf32>
    %cst_22 = arith.constant dense<0.000000e+00> : vector<4x256xf32>
    %41 = vector.multi_reduction <add>, %40, %cst_22 [1] : vector<4x4x256xf32> to vector<4x256xf32>
    %42 = arith.addf %34, %41 : vector<4x256xf32>
    %43 = vector.extract_strided_slice %1 {offsets = [0, 18], sizes = [4, 256], strides = [1, 1]} : vector<4x384xf32> to vector<4x256xf32>
    %c5 = arith.constant 5 : index
    %c0_23 = arith.constant 0 : index
    %c0_24 = arith.constant 0 : index
    %c0_25 = arith.constant 0 : index
    %44 = vector.load %arg2[%c5, %c0_23, %c0_24, %c0_25] : memref<9x4x4x256xf32, #tpu.memory_space<vmem>>, vector<1x4x4x256xf32>
    %45 = vector.shape_cast %44 : vector<1x4x4x256xf32> to vector<4x4x256xf32>
    %46 = vector.shape_cast %43 : vector<4x256xf32> to vector<1x4x256xf32>
    %47 = vector.broadcast %46 : vector<1x4x256xf32> to vector<4x4x256xf32>
    %48 = arith.mulf %47, %45 : vector<4x4x256xf32>
    %cst_26 = arith.constant dense<0.000000e+00> : vector<4x256xf32>
    %49 = vector.multi_reduction <add>, %48, %cst_26 [1] : vector<4x4x256xf32> to vector<4x256xf32>
    %50 = arith.addf %42, %49 : vector<4x256xf32>
    %51 = vector.extract_strided_slice %1 {offsets = [0, 32], sizes = [4, 256], strides = [1, 1]} : vector<4x384xf32> to vector<4x256xf32>
    %c6 = arith.constant 6 : index
    %c0_27 = arith.constant 0 : index
    %c0_28 = arith.constant 0 : index
    %c0_29 = arith.constant 0 : index
    %52 = vector.load %arg2[%c6, %c0_27, %c0_28, %c0_29] : memref<9x4x4x256xf32, #tpu.memory_space<vmem>>, vector<1x4x4x256xf32>
    %53 = vector.shape_cast %52 : vector<1x4x4x256xf32> to vector<4x4x256xf32>
    %54 = vector.shape_cast %51 : vector<4x256xf32> to vector<1x4x256xf32>
    %55 = vector.broadcast %54 : vector<1x4x256xf32> to vector<4x4x256xf32>
    %56 = arith.mulf %55, %53 : vector<4x4x256xf32>
    %cst_30 = arith.constant dense<0.000000e+00> : vector<4x256xf32>
    %57 = vector.multi_reduction <add>, %56, %cst_30 [1] : vector<4x4x256xf32> to vector<4x256xf32>
    %58 = arith.addf %50, %57 : vector<4x256xf32>
    %59 = vector.extract_strided_slice %1 {offsets = [0, 33], sizes = [4, 256], strides = [1, 1]} : vector<4x384xf32> to vector<4x256xf32>
    %c7 = arith.constant 7 : index
    %c0_31 = arith.constant 0 : index
    %c0_32 = arith.constant 0 : index
    %c0_33 = arith.constant 0 : index
    %60 = vector.load %arg2[%c7, %c0_31, %c0_32, %c0_33] : memref<9x4x4x256xf32, #tpu.memory_space<vmem>>, vector<1x4x4x256xf32>
    %61 = vector.shape_cast %60 : vector<1x4x4x256xf32> to vector<4x4x256xf32>
    %62 = vector.shape_cast %59 : vector<4x256xf32> to vector<1x4x256xf32>
    %63 = vector.broadcast %62 : vector<1x4x256xf32> to vector<4x4x256xf32>
    %64 = arith.mulf %63, %61 : vector<4x4x256xf32>
    %cst_34 = arith.constant dense<0.000000e+00> : vector<4x256xf32>
    %65 = vector.multi_reduction <add>, %64, %cst_34 [1] : vector<4x4x256xf32> to vector<4x256xf32>
    %66 = arith.addf %58, %65 : vector<4x256xf32>
    %67 = vector.extract_strided_slice %1 {offsets = [0, 34], sizes = [4, 256], strides = [1, 1]} : vector<4x384xf32> to vector<4x256xf32>
    %c8 = arith.constant 8 : index
    %c0_35 = arith.constant 0 : index
    %c0_36 = arith.constant 0 : index
    %c0_37 = arith.constant 0 : index
    %68 = vector.load %arg2[%c8, %c0_35, %c0_36, %c0_37] : memref<9x4x4x256xf32, #tpu.memory_space<vmem>>, vector<1x4x4x256xf32>
    %69 = vector.shape_cast %68 : vector<1x4x4x256xf32> to vector<4x4x256xf32>
    %70 = vector.shape_cast %67 : vector<4x256xf32> to vector<1x4x256xf32>
    %71 = vector.broadcast %70 : vector<1x4x256xf32> to vector<4x4x256xf32>
    %72 = arith.mulf %71, %69 : vector<4x4x256xf32>
    %cst_38 = arith.constant dense<0.000000e+00> : vector<4x256xf32>
    %73 = vector.multi_reduction <add>, %72, %cst_38 [1] : vector<4x4x256xf32> to vector<4x256xf32>
    %74 = arith.addf %66, %73 : vector<4x256xf32>
    %c0_39 = arith.constant 0 : index
    %c0_40 = arith.constant 0 : index
    %c0_41 = arith.constant 0 : index
    %75 = vector.load %arg3[%c0_39, %c0_40, %c0_41] : memref<1x4x256xf32, #tpu.memory_space<vmem>>, vector<1x4x256xf32>
    %76 = vector.shape_cast %75 : vector<1x4x256xf32> to vector<4x256xf32>
    %77 = vector.shape_cast %74 : vector<4x256xf32> to vector<1x4x256xf32>
    tpu.vector_store %arg3[%c0_39, %c0_40, %c0_41], %77 {strides = array<i32>} : memref<1x4x256xf32, #tpu.memory_space<vmem>>, vector<1x4x256xf32>,
    return
  }
  func.func @transform_0(%arg0: i32) -> (i32, i32, i32) {
    %c0_i32 = arith.constant 0 : i32
    %c0_i32_0 = arith.constant 0 : i32
    %c0_i32_1 = arith.constant 0 : i32
    return %arg0, %c0_i32, %c0_i32_0 : i32, i32, i32
  }
  func.func @transform_1(%arg0: i32) -> (i32, i32, i32, i32) {
    %c0_i32 = arith.constant 0 : i32
    %c0_i32_0 = arith.constant 0 : i32
    %c0_i32_1 = arith.constant 0 : i32
    %c0_i32_2 = arith.constant 0 : i32
    %c0_i32_3 = arith.constant 0 : i32
    return %c0_i32, %c0_i32_0, %c0_i32_1, %c0_i32_2 : i32, i32, i32, i32
  }
  func.func @transform_2(%arg0: i32) -> (i32, i32, i32) {
    %c0_i32 = arith.constant 0 : i32
    %c0_i32_0 = arith.constant 0 : i32
    %c0_i32_1 = arith.constant 0 : i32
    return %arg0, %c0_i32, %c0_i32_0 : i32, i32, i32
  }
}

</mosaic_0001>

<bundles_post_ra>
// kernel: tpu_custom_call.1
= control target key start
LH: loop header
LB: loop body
LE: loop exit
PB: predicated region body
PF: predicated region fallthrough
CT: control target
= control target key end

     0   :  { %7 = vsyncpa [#allocation3], 0  ;;  %s3468_s0 = inlined_call_operand.hbm [shape: f32[2,4,384], index: 0, kind: input, shape index: {}]   ;;  %s3469_s1 = inlined_call_operand.hbm [shape: f32[9,4,4,256], index: 1, kind: input, shape index: {}]   ;;  %s3470_s2 = inlined_call_operand.hbm [shape: f32[2,4,256], index: 2, kind: output, shape index: {}]  }
   0x1   :  { %9 = vsyncpa [#allocation3 + $0x1], 0 }
   0x2   :  { %10 = vsyncpa [#allocation6], 0 }
   0x3   :  { %11 = vsyncpa [#allocation4], 0 }
   0x4   :  { %13 = vsyncpa [#allocation4 + $0x1], 0  ;;  %s2248_s9 = smov 0   ;;  %s2250_s10 = smov 0  }
   0x5   :  { %s2252_s11 = smov 0   ;;  %s2254_s12 = smov 0  }
   0x6 LB: > { %s2269_s13 = sadd.s32 4294967295, %s2210_s12   ;;  %s1994_s14 = sadd.s32 4294967294, %s2210_s12   ;;  %s2210_s12 = sphi %s2254_s12, %s3570_s12   ;;  %s2206_s11 = sphi %s2252_s11, %s3569_s11   ;;  %s2202_s10 = sphi %s2250_s10, %s3568_s10   ;;  %s2198_s9 = sphi %s2248_s9, %s3567_s9  }
   0x7   : > { %p39_p0 = scmp.ne.s32.totalorder %s2202_s10, %s2198_s9  ;;  %p3471_p1 = scmp.eq.s32.totalorder %s2269_s13, 0 }
   0x8   : > { %p90_p3 = scmp.eq.s32.totalorder %s1994_s14, 1  ;;  %p1995_p5 = scmp.ge.s32.totalorder %s2210_s12, 1 }
   0x9   : > { %p2278_p4 = por %p3471_p1, %p39_p0  ;;  %p97_p7 = scmp.lt.s32.totalorder %s2210_s12, 3 }
   0xa   : > { %p2283_p6 = por %p90_p3, %p39_p0  ;;  %s2212_s18 = smov [#allocation5]  }
   0xb   : > { %s3486_s15 = scalar_select %p2278_p4, 1, 0 }
   0xc   : > { %s3487_s16 = scalar_select %p2283_p6, 1, 0 }
   0xd   : > { %p2288_p8 = pnand %p1995_p5, %p97_p7  ;;  %s109_s19 = sshll.u32 %s2212_s18, 4  ;;  %s110_s19 = int_to_ptr.vmem [resolvable:$true] %s109_s19 }
   0xe   : > { %s2302_s21 = sadd.s32 1, %s2210_s12   ;;  %s26_s22 = sadd.s32 1, %s2206_s11 }
   0xf   : > { %s3488_s17 = scalar_select %p2288_p8, 1, 0 }
  0x10   : > { %p2019_p9 = pneg %p2288_p8  ;;  %s23_s23 = ssub.s32 %s2210_s12, %s2302_s21 }
  0x11   : > { %s2099_s24 = scalar_lea.vmem %s110_s19, 4608  ;;  %p2107_p5 = scmp.lt.s32.totalorder %s110_s19, %s110_s19 }
  0x12   : > { %p2297_p11 = pnand %p2019_p9, %p3471_p1  ;;  %p2100_p13 = scmp.ne.s32.totalorder %s110_s19, %s2099_s24 }
  0x13   : > { %p2108_p7 = scmp.lt.s32.totalorder %s2099_s24, %s2099_s24 }
  0x14   : > { %p2090_p12 = pneg %p2297_p11 }
  0x15   : > { %p2109_p10 = por %p2108_p7, %p2107_p5 }
  0x16   : > { %p2102_p0 = pnand %p2100_p13, %p2090_p12 }
  0x18   : > { %p2103_p3 = pneg %p2102_p0 }
  0x1a   : > { %p2110_p2 = pnand %p2109_p10, %p2103_p3 }
  0x1c   : > { %2113 = shalt.err (!%p2110_p2)
}
  0x1d   : > { %s2213_s25 = smov 128   ;;  %s2214_s26 = smov 8  }
  0x1e   : > { %2022 = dma.hbm_to_vmem [thread:$0]  (!%p2297_p11), %s3469_s1, 4608, %s110_s19, [#allocation6], %s2213_s25, %s2213_s25, %s2214_s26  }
  0x1f   : > { %p24_p9 = scmp.eq.s32.totalorder %s23_s23, 0  ;;  %p33_p12 = scmp.ne.s32.totalorder %s2206_s11, %s2202_s10 }
  0x20   : > { %p34_p10 = scmp.eq.s32.totalorder %s2210_s12, 0  ;;  %p2032_p2 = scmp.lt.s32.totalorder %s2210_s12, 2 }
  0x21   : > { %s2319_s29 = scalar_select %p24_p9, %s2206_s11, %s26_s22  }
  0x22   : > { %p35_p13 = por %p34_p10, %p33_p12  ;;  %p3490_p0 = scmp.eq.s32.totalorder %s2269_s13, 1 }
  0x23   : > { %s123_s3 = sand.u32 1, %s2206_s11   ;;  %s2009_s4 = smul.u32 192, %s2210_s12 }
  0x24   : > { %p2323_p3 = por %p3490_p0, %p33_p12  ;;  %s2008_s5 = smul.u32 12, %s123_s3 }
  0x25   : > { %p2329_p5 = pnand %p2032_p2, %p35_p13  ;;  %s2336_s14 = scalar_lea.hbm %s3468_s0, %s2009_s4 }
  0x26   : > { %s3491_s30 = scalar_select %p2323_p3, 1, 0 }
  0x27   : > { %s127_s18 = scalar_lea.vmem [#allocation2], %s2008_s5  ;;  %s124_s20 = scalar_lea.sflag [#allocation3], %s123_s3 }
  0x28   : > { %s135_s19 = sshll.u32 %s127_s18, 4  ;;  %s2114_s22 = scalar_lea.hbm %s2336_s14, 192  ;;  %s136_s19 = int_to_ptr.vmem [resolvable:$true] %s135_s19 }
  0x29   : > { %p2115_p11 = scmp.ne.s32.totalorder %s2336_s14, %s2114_s22  ;;  %p2116_p7 = pneg %p2329_p5 }
  0x2a   : > { %s2119_s25 = scalar_lea.hbm %s3468_s0, 384  ;;  %p2120_p10 = scmp.lt.s32.totalorder %s2336_s14, %s3468_s0 }
  0x2b   : > { %p2117_p9 = pnand %p2116_p7, %p2115_p11  ;;  %p2121_p2 = scmp.lt.s32.totalorder %s2119_s25, %s2114_s22 }
  0x2d   : > { %p2118_p12 = pneg %p2117_p9  ;;  %p2122_p13 = por %p2121_p2, %p2120_p10 }
  0x2f   : > { %p2123_p0 = pnand %p2122_p13, %p2118_p12 }
  0x31   : > { %2126 = shalt.err (!%p2123_p0)
}
  0x32   : > { %s2127_s28 = scalar_lea.vmem %s136_s19, 192  ;;  %s2215_s3 = smov [#allocation2]  }
  0x33   : > { %p2128_p1 = scmp.ne.s32.totalorder %s136_s19, %s2127_s28  ;;  %s2132_s4 = sshll.u32 %s2215_s3, 4  ;;  %s2133_s4 = int_to_ptr.vmem [resolvable:$false] %s2132_s4 }
  0x34   : > { %s2134_s5 = scalar_lea.vmem %s2133_s4, 384  ;;  %p2135_p11 = scmp.lt.s32.totalorder %s136_s19, %s2133_s4 }
  0x35   : > { %p2130_p6 = pnand %p2128_p1, %p2116_p7  ;;  %p2136_p9 = scmp.lt.s32.totalorder %s2134_s5, %s2127_s28 }
  0x37   : > { %p2131_p3 = pneg %p2130_p6  ;;  %p2137_p4 = por %p2136_p9, %p2135_p11 }
  0x39   : > { %p2138_p8 = pnand %p2137_p4, %p2131_p3 }
  0x3b   : > { %2141 = shalt.err (!%p2138_p8)
}
  0x3c   : > { %2026 = dma.hbm_to_vmem [thread:$0]  (!%p2329_p5), %s2336_s14, 192, %s136_s19, %s124_s20  }
  0x3d   : > { %p3493_p12 = scmp.ne.s32.totalorder %s3488_s17, 0 }
  0x3f   : > { %144 = sbr.rel (%p3493_p12) target bundleno = 585 (0x249), region = 28 }
  0x44   : > { %s2355_s7 = sand.u32 1, %s2202_s10   ;;  %p3494_p1 = scmp.ne.s32.totalorder %s3486_s15, 0 }
  0x45   : > { %s2010_s8 = smul.u32 12, %s2355_s7  ;;  %s147_s18 = scalar_lea.sflag [#allocation3], %s2355_s7 }
  0x47   : > { %s2359_s22 = scalar_lea.vmem [#allocation2], %s2010_s8 }
  0x48   : > { %2185 = dma.done.wait (%p3494_p1), %s147_s18, 192  }
  0x49   : > { %2187 = vsyncadd (%p3494_p1), %s147_s18, 4294967104  ;;  %p3495_p4 = scmp.eq.s32.totalorder %s2269_s13, 0 }
  0x4b   : > { %2189 = dma.done.wait (%p3495_p4), [#allocation6], 4608   ;;  %p3496_p6 = pmov %p3495_p4 }
  0x4c   : > { %v265_v0 = vld [vmem:[#allocation5 + $0x30] sm:$0xff]  ;;  %v263_v1 = vld [vmem:[#allocation5 + $0x20] sm:$0xff]  ;;  %s2216_s17 = smov 1   ;;  %v266_v2 = vld [vmem:[#allocation5 + $0x38] sm:$0xff]  ;;  %s2217_s6 = smov 2   ;;  %vm283_vm0 = vcmask 7168  }
  0x4d   : > { %2191 = vsyncadd (%p3496_p6), [#allocation6], 4294962688  ;;  %275 = vrot.lane.b32.xlu1 %v265_v0, %s2216_s17  ;;  %271 = vrot.lane.b32.xlu0 %v263_v1, %s2216_s17  ;;  %v264_v3 = vld [vmem:[#allocation5 + $0x28] sm:$0xff]  ;;  %v464_v5 = vld [vmem:[#allocation5 + $0x40] sm:$0xff]  ;;  %s2218_s15 = smov 16   ;;  %s2219_s14 = smov 17  }
  0x4e   : > { %v465_v4 = vld [vmem:[#allocation5 + $0x48] sm:$0xff]  ;;  %v467_v6 = vld [vmem:[#allocation5 + $0x58] sm:$0xff]  ;;  %v466_v7 = vld [vmem:[#allocation5 + $0x50] sm:$0xff]  ;;  %s2220_s19 = smov 18   ;;  %s2221_s20 = smov 32   ;;  %vm316_vm1 = vcmask 1043464  }
  0x4f   : > { %v666_v8 = vld [vmem:[#allocation5 + $0x68] sm:$0xff]  ;;  %v665_v9 = vld [vmem:[#allocation5 + $0x60] sm:$0xff]  ;;  %v668_v10 = vld [vmem:[#allocation5 + $0x78] sm:$0xff]  ;;  %s2222_s23 = smov 33   ;;  %s2223_s24 = smov 34   ;;  %vm331_vm2 = vcmask 3072  }
  0x50   : > { %v667_v11 = vld [vmem:[#allocation5 + $0x70] sm:$0xff]  ;;  %v866_v12 = vld [vmem:[#allocation5 + $0x80] sm:$0xff]  ;;  %v867_v13 = vld [vmem:[#allocation5 + $0x88] sm:$0xff]  ;;  %vm484_vm3 = vcmask 15360   ;;  %vm197_vm4 = vcmask 1043456   ;;  %vm517_vm5 = vcmask 1043472  }
  0x51   : > { %277 = vrot.lane.b32.xlu1 %v266_v2, %s2216_s17  ;;  %273 = vrot.lane.b32.xlu0 %v264_v3, %s2216_s17  ;;  %v868_v14 = vld [vmem:[#allocation5 + $0x90] sm:$0xff]  ;;  %v1068_v15 = vld [vmem:[#allocation5 + $0xa8] sm:$0xff]  ;;  %v869_v16 = vld [vmem:[#allocation5 + $0x98] sm:$0xff]  ;;  %vm532_vm6 = vcmask 11264   ;;  %vm685_vm7 = vcmask 130048   ;;  %vm718_vm8 = vcmask 1043584  }
  0x52   : > { %v1067_v17 = vld [vmem:[#allocation5 + $0xa0] sm:$0xff]  ;;  %v1269_v18 = vld [vmem:[#allocation5 + $0xc8] sm:$0xff]  ;;  %v1069_v19 = vld [vmem:[#allocation5 + $0xb0] sm:$0xff]  ;;  %vm733_vm9 = vcmask 125952   ;;  %vm934_vm10 = vcmask 134144   ;;  %s2224_s25 = smov 127  }
  0x53   : > { %v1268_v20 = vld [vmem:[#allocation5 + $0xc0] sm:$0xff]  ;;  %v1070_v21 = vld [vmem:[#allocation5 + $0xb8] sm:$0xff]  ;;  %v1470_v22 = vld [vmem:[#allocation5 + $0xe8] sm:$0xff]  ;;  %vm886_vm11 = vcmask 138240   ;;  %vm919_vm12 = vcmask 1043592   ;;  %s2225_s26 = smov 126  }
  0x54   : > { %v1270_v23 = vld [vmem:[#allocation5 + $0xd0] sm:$0xff]  ;;  %v1469_v24 = vld [vmem:[#allocation5 + $0xe0] sm:$0xff]  ;;  %v1271_v25 = vld [vmem:[#allocation5 + $0xd8] sm:$0xff]  ;;  %s2226_s27 = smov 112   ;;  %s2227_s28 = smov 111   ;;  %vm1087_vm13 = vcmask 146432  }
  0x55   : > { %474 = vrot.lane.b32.xlu1 %v465_v4, %s2217_s6  ;;  %472 = vrot.lane.b32.xlu0 %v464_v5, %s2217_s6  ;;  %v1671_v26 = vld [vmem:[#allocation5 + $0x108] sm:$0xff]  ;;  %v1471_v27 = vld [vmem:[#allocation5 + $0xf0] sm:$0xff]  ;;  %v1670_v28 = vld [vmem:[#allocation5 + $0x100] sm:$0xff]  ;;  %vm1120_vm14 = vcmask 1043600   ;;  %vm1135_vm15 = vcmask 142336   ;;  %s2228_s3 = smov 110  }
  0x56   : > { %v1472_v29 = vld [vmem:[#allocation5 + $0xf8] sm:$0xff]  ;;  %v1672_v31 = vld [vmem:[#allocation5 + $0x110] sm:$0xff]  ;;  %s2229_s4 = smov 96   ;;  %s2230_s5 = smov 95  }
  0x57   : > { %v1673_v30 = vld [vmem:[#allocation5 + $0x118] sm:$0xff]  ;;  %s2231_s8 = smov 94   ;;  %s2001_s18 = sshll.u32 %s2355_s7, 3 }
  0x58   : > { %v2370_v37 = vld [vmem:[%s2359_s22] sm:$0xff]  ;;  %v2374_v41 = vld [vmem:[%s2359_s22 + $0x8] sm:$0xf]  ;;  %s174_s17 = scalar_lea.vmem [#allocation7], %s2001_s18  ;;  %p3564_p3 = scmp.ne.s32.totalorder %s3491_s30, 0 }
  0x59   : > { %478 = vrot.lane.b32.xlu1 %v467_v6, %s2217_s6  ;;  %476 = vrot.lane.b32.xlu0 %v466_v7, %s2217_s6  ;;  %s1914_s6 = sshll.u32 %s174_s17, 4  ;;  %s1915_s6 = int_to_ptr.vmem [resolvable:$true] %s1914_s6 }
  0x5d   : > { %675 = vrot.lane.b32.xlu1 %v666_v8, %s2218_s15  ;;  %673 = vrot.lane.b32.xlu0 %v665_v9, %s2218_s15 }
  0x61   : > { %679 = vrot.lane.b32.xlu1 %v668_v10, %s2218_s15  ;;  %677 = vrot.lane.b32.xlu0 %v667_v11, %s2218_s15 }
  0x65   : > { %874 = vrot.lane.b32.xlu0 %v866_v12, %s2219_s14  ;;  %876 = vrot.lane.b32.xlu1 %v867_v13, %s2219_s14 }
  0x69   : > { %878 = vrot.lane.b32.xlu0 %v868_v14, %s2219_s14  ;;  %1077 = vrot.lane.b32.xlu1 %v1068_v15, %s2220_s19 }
  0x6d   : > { %880 = vrot.lane.b32.xlu0 %v869_v16, %s2219_s14  ;;  %1075 = vrot.lane.b32.xlu1 %v1067_v17, %s2220_s19 }
  0x71   : > { %1278 = vrot.lane.b32.xlu1 %v1269_v18, %s2221_s20  ;;  %1079 = vrot.lane.b32.xlu0 %v1069_v19, %s2220_s19 }
  0x75   : > { %1276 = vrot.lane.b32.xlu1 %v1268_v20, %s2221_s20  ;;  %1081 = vrot.lane.b32.xlu0 %v1070_v21, %s2220_s19 }
  0x79   : > { %1479 = vrot.lane.b32.xlu1 %v1470_v22, %s2222_s23  ;;  %1280 = vrot.lane.b32.xlu0 %v1270_v23, %s2221_s20 }
  0x7d   : > { %1477 = vrot.lane.b32.xlu1 %v1469_v24, %s2222_s23  ;;  %1282 = vrot.lane.b32.xlu0 %v1271_v25, %s2221_s20  ;;  %s1900_s20 = scalar_lea.sflag [#allocation4], %s2355_s7 }
  0x81   : > { %1680 = vrot.lane.b32.xlu1 %v1671_v26, %s2223_s24  ;;  %1481 = vrot.lane.b32.xlu0 %v1471_v27, %s2222_s23 }
  0x85   : > { %1678 = vrot.lane.b32.xlu1 %v1670_v28, %s2223_s24  ;;  %1483 = vrot.lane.b32.xlu0 %v1472_v29, %s2222_s23  ;;  %s2142_s23 = scalar_lea.vmem %s1915_s6, 128 }
  0x86   : > { %p2143_p8 = scmp.ne.s32.totalorder %s1915_s6, %s2142_s23 }
  0x88   : > { %p2144_p5 = pnand %p2143_p8, %p3564_p3 }
  0x89   : > { %1684 = vrot.lane.b32.xlu1 %v1673_v30, %s2223_s24  ;;  %1682 = vrot.lane.b32.xlu0 %v1672_v31, %s2223_s24 }
  0x8a   : > { %p2145_p7 = pneg %p2144_p5 }
  0xbf   : > { %v276_v32 = vpop.permute.xlu1 %275  ;;  %v272_v33 = vpop.permute.xlu0 %271 }
  0xc0   : > { %v281_v34 = vrot.slane %v276_v32, 4  ;;  %v279_v35 = vrot.slane %v272_v33, 4 }
  0xc2   : > { %v286_v38 = vsel %vm283_vm0, %v281_v34, %v276_v32  ;;  %v284_v42 = vsel %vm283_vm0, %v279_v35, %v272_v33  ;;  %v301_v46 = vmul.f32 %v281_v34, %v2374_v41  ;;  %v297_v52 = vmul.f32 %v279_v35, %v2374_v41 }
  0xc3   : > { %v278_v36 = vpop.permute.xlu1 %277  ;;  %v274_v40 = vpop.permute.xlu0 %273  ;;  %v300_v43 = vmul.f32 %v286_v38, %v2370_v37  ;;  %v296_v47 = vmul.f32 %v284_v42, %v2370_v37 }
  0xc4   : > { %v282_v39 = vrot.slane %v278_v36, 4  ;;  %v280_v45 = vrot.slane %v274_v40, 4  ;;  %v2386_v56 = vsel %vm331_vm2, %v301_v46, 0.0  ;;  %v332_v3 = vsel %vm331_vm2, %v297_v52, 0.0 }
  0xc5   : > { %v310_v51 = vcombine.high %v300_v43, %v300_v43  ;;  %v360_v55 = vsel %vm316_vm1, %v300_v43, 0.0  ;;  %v308_v57 = vcombine.high %v296_v47, %v296_v47  ;;  %v317_v58 = vsel %vm316_vm1, %v296_v47, 0.0 }
  0xc6   : > { %v287_v44 = vsel %vm283_vm0, %v282_v39, %v278_v36  ;;  %v285_v53 = vsel %vm283_vm0, %v280_v45, %v274_v40  ;;  %v303_v59 = vmul.f32 %v282_v39, %v2374_v41  ;;  %v361_v0 = vrot.slane %v360_v55, 4 }
  0xc7   : > { %v475_v48 = vpop.permute.xlu1 %474  ;;  %v302_v49 = vmul.f32 %v287_v44, %v2370_v37  ;;  %v473_v50 = vpop.permute.xlu0 %472  ;;  %v298_v63 = vmul.f32 %v285_v53, %v2370_v37  ;;  %v2394_v1 = vsel %vm197_vm4, %v310_v51, 0.0  ;;  %v375_v2 = vrot.slane %v2386_v56, 4 }
  0xc8   : > { %v481_v54 = vrot.slane %v475_v48, 4  ;;  %v480_v61 = vrot.slane %v473_v50, 4  ;;  %v318_v5 = vrot.slane %v317_v58, 4  ;;  %v2399_v6 = vsel %vm197_vm4, %v308_v57, 0.0 }
  0xc9   : > { %v381_v62 = vsel %vm316_vm1, %v302_v49, 0.0  ;;  %v311_v7 = vcombine.high %v302_v49, %v302_v49  ;;  %v2403_v11 = vsel %vm331_vm2, %v303_v59, 0.0  ;;  %v299_v12 = vmul.f32 %v280_v45, %v2374_v41 }
  0xca   : > { %v486_v60 = vsel %vm484_vm3, %v481_v54, %v475_v48  ;;  %v382_v10 = vrot.slane %v381_v62, 4  ;;  %v485_v13 = vsel %vm484_vm3, %v480_v61, %v473_v50  ;;  %v309_v14 = vcombine.high %v298_v63, %v298_v63 }
  0xcb   : > { %v479_v4 = vpop.permute.xlu1 %478  ;;  %v499_v8 = vmul.f32 %v486_v60, %v2370_v37  ;;  %v477_v9 = vpop.permute.xlu0 %476  ;;  %v339_v15 = vsel %vm316_vm1, %v298_v63, 0.0  ;;  %v500_v16 = vmul.f32 %v481_v54, %v2374_v41  ;;  %v2409_v18 = vadd.f32 %v361_v0, %v360_v55 }
  0xcc   : > { %v483_v17 = vrot.slane %v479_v4, 4  ;;  %v333_v20 = vrot.slane %v332_v3, 4  ;;  %v482_v21 = vrot.slane %v477_v9, 4  ;;  %v2412_v22 = vadd.f32 %v318_v5, %v317_v58 }
  0xcd   : > { %v540_v24 = vsel %vm517_vm5, %v499_v8, 0.0  ;;  %v497_v25 = vmul.f32 %v485_v13, %v2370_v37  ;;  %v2417_v26 = vadd.f32 %v382_v10, %v381_v62  ;;  %v2420_v27 = vsel %vm197_vm4, %v311_v7, 0.0 }
  0xce   : > { %v396_v28 = vrot.slane %v2403_v11, 4  ;;  %v340_v29 = vrot.slane %v339_v15, 4  ;;  %v2424_v31 = vsel %vm197_vm4, %v309_v14, 0.0  ;;  %v353_v32 = vsel %vm331_vm2, %v299_v12, 0.0 }
  0xcf   : > { %v676_v30 = vpop.permute.xlu1 %675  ;;  %v2428_v33 = vsel %vm532_vm6, %v500_v16, 0.0  ;;  %v488_v34 = vsel %vm484_vm3, %v483_v17, %v479_v4  ;;  %v510_v35 = vcombine.high %v499_v8, %v499_v8  ;;  %v541_v36 = vrot.slane %v540_v24, 4  ;;  %v674_v45 = vpop.permute.xlu0 %673 }
  0xd0   : > { %v498_v38 = vmul.f32 %v480_v61, %v2374_v41  ;;  %v487_v39 = vsel %vm484_vm3, %v482_v21, %v477_v9  ;;  %v509_v40 = vcombine.high %v497_v25, %v497_v25  ;;  %v518_v42 = vsel %vm517_vm5, %v497_v25, 0.0 }
  0xd1   : > { %v504_v43 = vmul.f32 %v483_v17, %v2374_v41  ;;  %v682_v44 = vrot.slane %v676_v30, 4  ;;  %v354_v47 = vrot.slane %v353_v32, 4  ;;  %v503_v48 = vmul.f32 %v488_v34, %v2370_v37 }
  0xd2   : > { %v334_v49 = vadd.f32 %v333_v20, %v332_v3  ;;  %v2437_v50 = vadd.f32 %v340_v29, %v339_v15  ;;  %v555_v52 = vrot.slane %v2428_v33, 4  ;;  %v501_v53 = vmul.f32 %v487_v39, %v2370_v37 }
  0xd3   : > { %v2442_v54 = vadd.f32 %v541_v36, %v540_v24  ;;  %v2445_v55 = vsel %vm197_vm4, %v510_v35, 0.0  ;;  %v519_v57 = vrot.slane %v518_v42, 4  ;;  %v533_v58 = vsel %vm532_vm6, %v498_v38, 0.0  ;;  %v680_v10 = vpop.permute.xlu1 %679  ;;  %v2459_v12 = vpop.permute.xlu0 %677 }
  0xd4   : > { %v2449_v59 = vsel %vm197_vm4, %v509_v40, 0.0  ;;  %v2452_v60 = vsel %vm532_vm6, %v504_v43, 0.0  ;;  %v502_v61 = vmul.f32 %v482_v21, %v2374_v41  ;;  %v687_v62 = vsel %vm685_vm7, %v682_v44, %v676_v30 }
  0xd5   : > { %v512_v63 = vcombine.high %v503_v48, %v503_v48  ;;  %v582_v0 = vsel %vm517_vm5, %v503_v48, 0.0  ;;  %v681_v3 = vrot.slane %v674_v45, 4  ;;  %v335_v4 = vrot.slane %v334_v49, 2 }
  0xd6   : > { %v534_v7 = vrot.slane %v533_v58, 4  ;;  %v511_v8 = vcombine.high %v501_v53, %v501_v53  ;;  %v561_v9 = vsel %vm517_vm5, %v501_v53, 0.0  ;;  %v2461_v13 = vadd.f32 %v519_v57, %v518_v42 }
  0xd7   : > { %v700_v15 = vmul.f32 %v687_v62, %v2370_v37  ;;  %v701_v16 = vmul.f32 %v682_v44, %v2374_v41  ;;  %v583_v17 = vrot.slane %v582_v0, 4  ;;  %v597_v20 = vrot.slane %v2452_v60, 4  ;;  %v2486_v57 = vpop.permute.xlu0 %874 }
  0xd8   : > { %v575_v21 = vsel %vm532_vm6, %v502_v61, 0.0  ;;  %v336_v24 = vadd.f32 %v335_v4, %v334_v49  ;;  %v2469_v25 = vsel %vm197_vm4, %v512_v63, 0.0  ;;  %v562_v29 = vrot.slane %v561_v9, 4 }
  0xd9   : > { %v686_v30 = vsel %vm685_vm7, %v681_v3, %v674_v45  ;;  %v684_v34 = vrot.slane %v680_v10, 4  ;;  %v2473_v35 = vsel %vm197_vm4, %v511_v8, 0.0  ;;  %v683_v38 = vrot.slane %v2459_v12, 4 }
  0xda   : > { %v337_v36 = vrot.slane %v336_v24, 1  ;;  %v355_v39 = vadd.f32 %v354_v47, %v353_v32  ;;  %v576_v40 = vrot.slane %v575_v21, 4  ;;  %v711_v42 = vcombine.high %v700_v15, %v700_v15 }
  0xdb   : > { %v2477_v43 = vsel %vm718_vm8, %v700_v15, 0.0  ;;  %v755_v44 = vsel %vm733_vm9, %v701_v16, 0.0  ;;  %v2480_v48 = vadd.f32 %v583_v17, %v582_v0  ;;  %v2483_v45 = vmul.f32 %v686_v30, %v2370_v37 }
  0xdc   : > { %v699_v49 = vmul.f32 %v681_v3, %v2374_v41  ;;  %v338_v53 = vadd.f32 %v337_v36, %v336_v24  ;;  %v2489_v32 = vadd.f32 %v562_v29, %v561_v9  ;;  %v705_v62 = vmul.f32 %v684_v34, %v2374_v41 }
  0xdd   : > { %v742_v63 = vrot.slane %v2477_v43, 4  ;;  %v756_v0 = vrot.slane %v755_v44, 4  ;;  %v703_v3 = vmul.f32 %v683_v38, %v2374_v41  ;;  %v356_v4 = vrot.slane %v355_v39, 2 }
  0xde   : > { %418 = vrot.lane.b32.xlu0 %v338_v53, %s2224_s25  ;;  %v2499_v8 = vsel %vm197_vm4, %v711_v42, 0.0  ;;  %v376_v9 = vadd.f32 %v375_v2, %v2386_v56  ;;  %v882_v15 = vrot.slane %v2486_v57, 4  ;;  %v397_v16 = vadd.f32 %v396_v28, %v2403_v11 }
  0xdf   : > { %v710_v17 = vcombine.high %v2483_v45, %v2483_v45  ;;  %v734_v24 = vsel %vm733_vm9, %v699_v49, 0.0  ;;  %v357_v29 = vadd.f32 %v356_v4, %v355_v39  ;;  %v535_v30 = vadd.f32 %v534_v7, %v533_v58 }
  0xe0   : > { %v797_v36 = vsel %vm733_vm9, %v705_v62, 0.0  ;;  %v377_v42 = vrot.slane %v376_v9, 2  ;;  %v900_v56 = vmul.f32 %v882_v15, %v2374_v41  ;;  %v398_v2 = vrot.slane %v397_v16, 2 }
  0xe1   : > { %v776_v53 = vsel %vm733_vm9, %v703_v3, 0.0  ;;  %v358_v47 = vrot.slane %v357_v29, 1  ;;  %v536_v61 = vrot.slane %v535_v30, 2  ;;  %v556_v11 = vadd.f32 %v555_v52, %v2428_v33 }
  0xe2   : > { %v735_v28 = vrot.slane %v734_v24, 4  ;;  %v378_v49 = vadd.f32 %v377_v42, %v376_v9  ;;  %v399_v39 = vadd.f32 %v398_v2, %v397_v16  ;;  %v577_v58 = vadd.f32 %v576_v40, %v575_v21 }
  0xe3   : > { %v689_v7 = vsel %vm685_vm7, %v684_v34, %v680_v10  ;;  %v798_v62 = vrot.slane %v797_v36, 4  ;;  %v359_v4 = vadd.f32 %v358_v47, %v357_v29  ;;  %v935_v14 = vsel %vm934_vm10, %v900_v56, 0.0 }
  0xe4   : > { %v777_v5 = vrot.slane %v776_v53, 4  ;;  %v379_v19 = vrot.slane %v378_v49, 1  ;;  %v400_v3 = vrot.slane %v399_v39, 1  ;;  %v537_v46 = vadd.f32 %v536_v61, %v535_v30 }
  0xe5   : > { %v719_v23 = vsel %vm718_vm8, %v2483_v45, 0.0  ;;  %424 = vrot.lane.b32.xlu1 %v359_v4, %s2224_s25  ;;  %v557_v33 = vrot.slane %v556_v11, 2  ;;  %v578_v52 = vrot.slane %v577_v58, 2  ;;  %v598_v10 = vadd.f32 %v597_v20, %v2452_v60 }
  0xe6   : > { %v2528_v21 = vmul.f32 %v689_v7, %v2370_v37  ;;  %v380_v34 = vadd.f32 %v379_v19, %v378_v49  ;;  %v936_v40 = vrot.slane %v935_v14, 4  ;;  %v401_v47 = vadd.f32 %v400_v3, %v399_v39  ;;  %v2532_v3 = vpop.permute.xlu1 %876 }
  0xe7   : > { %v538_v9 = vrot.slane %v537_v46, 1  ;;  %v558_v16 = vadd.f32 %v557_v33, %v556_v11  ;;  %v579_v61 = vadd.f32 %v578_v52, %v577_v58  ;;  %v599_v29 = vrot.slane %v598_v10, 2 }
  0xe8   : > { %430 = vrot.lane.b32.xlu0 %v380_v34, %s2224_s25  ;;  %v736_v30 = vadd.f32 %v735_v28, %v734_v24  ;;  %v757_v42 = vadd.f32 %v756_v0, %v755_v44  ;;  %v778_v56 = vadd.f32 %v777_v5, %v776_v53  ;;  %v799_v2 = vadd.f32 %v798_v62, %v797_v36 }
  0xe9   : > { %436 = vrot.lane.b32.xlu1 %v401_v47, %s2224_s25  ;;  %v539_v4 = vadd.f32 %v538_v9, %v537_v46  ;;  %v559_v60 = vrot.slane %v558_v16, 1  ;;  %v580_v20 = vrot.slane %v579_v61, 1  ;;  %v600_v7 = vadd.f32 %v599_v29, %v598_v10 }
  0xea   : > { %v737_v51 = vrot.slane %v736_v30, 2  ;;  %v758_v19 = vrot.slane %v757_v42, 2  ;;  %v779_v49 = vrot.slane %v778_v56, 2  ;;  %v800_v39 = vrot.slane %v799_v2, 2 }
  0xeb   : > { %v2537_v11 = vadd.f32 %v742_v63, %v2477_v43  ;;  %v560_v5 = vadd.f32 %v559_v60, %v558_v16  ;;  %v601_v44 = vrot.slane %v600_v7, 1  ;;  %v937_v0 = vadd.f32 %v936_v40, %v935_v14 }
  0xec   : > { %619 = vrot.lane.b32.xlu0 %v539_v4, %s2225_s26  ;;  %v581_v46 = vadd.f32 %v580_v20, %v579_v61  ;;  %v738_v24 = vadd.f32 %v737_v51, %v736_v30  ;;  %v759_v36 = vadd.f32 %v758_v19, %v757_v42  ;;  %v780_v53 = vadd.f32 %v779_v49, %v778_v56 }
  0xed   : > { %v720_v28 = vrot.slane %v719_v23, 4  ;;  %v688_v58 = vsel %vm685_vm7, %v683_v38, %v2459_v12  ;;  %625 = vrot.lane.b32.xlu1 %v560_v5, %s2225_s26  ;;  %v938_v43 = vrot.slane %v937_v0, 2  ;;  %v883_v63 = vrot.slane %v2532_v3, 4 }
  0xee   : > { %v713_v14 = vcombine.high %v2528_v21, %v2528_v21  ;;  %v783_v62 = vsel %vm718_vm8, %v2528_v21, 0.0  ;;  %v739_v51 = vrot.slane %v738_v24, 1  ;;  %v801_v33 = vadd.f32 %v800_v39, %v799_v2 }
  0xef   : > { %v887_v52 = vsel %vm886_vm11, %v882_v15, %v2486_v57  ;;  %v602_v10 = vadd.f32 %v601_v44, %v600_v7  ;;  %v760_v12 = vrot.slane %v759_v36, 1  ;;  %v342_v38 = vrot.slane %v2437_v50, 2 }
  0xf0   : > { %631 = vrot.lane.b32.xlu0 %v581_v46, %s2225_s26  ;;  %v740_v34 = vadd.f32 %v739_v51, %v738_v24  ;;  %v781_v40 = vrot.slane %v780_v53, 1  ;;  %v939_v47 = vadd.f32 %v938_v43, %v937_v0  ;;  %v888_v9 = vsel %vm886_vm11, %v883_v63, %v2532_v3 }
  0xf1   : > { %v749_v21 = vrot.slane %v2499_v8, 4  ;;  %v2563_v16 = vsel %vm197_vm4, %v710_v17, 0.0  ;;  %v784_v57 = vrot.slane %v783_v62, 4  ;;  %v702_v15 = vmul.f32 %v688_v58, %v2370_v37  ;;  %637 = vrot.lane.b32.xlu1 %v602_v10, %s2225_s26 }
  0xf2   : > { %v2567_v61 = vadd.f32 %v720_v28, %v719_v23  ;;  %v899_v29 = vmul.f32 %v887_v52, %v2370_v37  ;;  %v802_v30 = vrot.slane %v801_v33, 1  ;;  %v320_v42 = vrot.slane %v2412_v22, 2 }
  0xf3   : > { %v761_v56 = vadd.f32 %v760_v12, %v759_v36  ;;  %v901_v2 = vmul.f32 %v888_v9, %v2370_v37  ;;  %v343_v45 = vadd.f32 %v342_v38, %v2437_v50  ;;  %v384_v17 = vrot.slane %v2417_v26, 2 }
  0xf4   : > { %v727_v4 = vrot.slane %v2563_v16, 4  ;;  %v2576_v60 = vsel %vm197_vm4, %v713_v14, 0.0  ;;  %820 = vrot.lane.b32.xlu0 %v740_v34, %s2226_s27  ;;  %v782_v23 = vadd.f32 %v781_v40, %v780_v53  ;;  %v940_v20 = vrot.slane %v939_v47, 1 }
  0xf5   : > { %v2579_v7 = vadd.f32 %v784_v57, %v783_v62  ;;  %v712_v19 = vcombine.high %v702_v15, %v702_v15  ;;  %v762_v49 = vsel %vm718_vm8, %v702_v15, 0.0  ;;  %826 = vrot.lane.b32.xlu1 %v761_v56, %s2226_s27  ;;  %v363_v50 = vrot.slane %v2409_v18, 2 }
  0xf6   : > { %v911_v39 = vcombine.high %v899_v29, %v899_v29  ;;  %v920_v3 = vsel %vm919_vm12, %v899_v29, 0.0  ;;  %v803_v5 = vadd.f32 %v802_v30, %v801_v33  ;;  %v321_v44 = vadd.f32 %v320_v42, %v2412_v22 }
  0xf7   : > { %v942_v0 = vsel %vm919_vm12, %v901_v2, 0.0  ;;  %v344_v46 = vrot.slane %v343_v45, 1  ;;  %v385_v24 = vadd.f32 %v384_v17, %v2417_v26  ;;  %v543_v36 = vrot.slane %v2442_v54, 2 }
  0xf8   : > { %v763_v53 = vrot.slane %v762_v49, 4  ;;  %832 = vrot.lane.b32.xlu0 %v782_v23, %s2226_s27  ;;  %v941_v28 = vadd.f32 %v940_v20, %v939_v47  ;;  %v521_v58 = vrot.slane %v2461_v13, 2  ;;  %v585_v43 = vrot.slane %v2480_v48, 2 }
  0xf9   : > { %v791_v14 = vrot.slane %v2576_v60, 4  ;;  %v2594_v62 = vsel %vm197_vm4, %v712_v19, 0.0  ;;  %v921_v22 = vrot.slane %v920_v3, 4  ;;  %838 = vrot.lane.b32.xlu1 %v803_v5, %s2226_s27  ;;  %v364_v26 = vadd.f32 %v363_v50, %v2409_v18 }
  0xfa   : > { %v2599_v51 = vsel %vm197_vm4, %v911_v39, 0.0  ;;  %v902_v33 = vmul.f32 %v883_v63, %v2374_v41  ;;  %v943_v52 = vrot.slane %v942_v0, 4  ;;  %v322_v10 = vrot.slane %v321_v44, 1 }
  0xfb   : > { %v912_v12 = vcombine.high %v901_v2, %v901_v2  ;;  %v345_v38 = vadd.f32 %v344_v46, %v343_v45  ;;  %v386_v34 = vrot.slane %v385_v24, 1  ;;  %v544_v40 = vadd.f32 %v543_v36, %v2442_v54  ;;  %v879_v45 = vpop.permute.xlu0 %878 }
  0xfc   : > { %v764_v47 = vadd.f32 %v763_v53, %v762_v49  ;;  %v770_v9 = vrot.slane %v2594_v62, 4  ;;  %1021 = vrot.lane.b32.xlu0 %v941_v28, %s2227_s28  ;;  %v522_v18 = vadd.f32 %v521_v58, %v2461_v13  ;;  %v586_v57 = vadd.f32 %v585_v43, %v2480_v48 }
  0xfd   : > { %v922_v15 = vadd.f32 %v921_v22, %v920_v3  ;;  %420 = vrot.lane.b32.xlu1 %v345_v38, %s2224_s25  ;;  %v365_v63 = vrot.slane %v364_v26, 1  ;;  %v564_v29 = vrot.slane %v2489_v32, 2  ;;  %v744_v30 = vrot.slane %v2537_v11, 2 }
  0xfe   : > { %v928_v54 = vrot.slane %v2599_v51, 4  ;;  %v944_v42 = vadd.f32 %v943_v52, %v942_v0  ;;  %v323_v56 = vadd.f32 %v322_v10, %v321_v44  ;;  %v722_v2 = vrot.slane %v2567_v61, 2 }
  0xff   : > { %v2613_v17 = vsel %vm197_vm4, %v912_v12, 0.0  ;;  %v2616_v13 = vsel %vm934_vm10, %v902_v33, 0.0  ;;  %v387_v48 = vadd.f32 %v386_v34, %v385_v24  ;;  %v545_v23 = vrot.slane %v544_v40, 1 }
 0x100   : > { %414 = vrot.lane.b32.xlu0 %v323_v56, %s2224_s25  ;;  %v523_v20 = vrot.slane %v522_v18, 1  ;;  %v587_v19 = vrot.slane %v586_v57, 1  ;;  %v786_v49 = vrot.slane %v2579_v7, 2  ;;  %v3497_v50 = vrot.slane %v2424_v31, 4 }
 0x101   : > { %432 = vrot.lane.b32.xlu1 %v387_v48, %s2224_s25  ;;  %v366_v3 = vadd.f32 %v365_v63, %v364_v26  ;;  %v565_v5 = vadd.f32 %v564_v29, %v2489_v32  ;;  %v745_v44 = vadd.f32 %v744_v30, %v2537_v11  ;;  %v884_v0 = vrot.slane %v879_v45, 4 }
 0x102   : > { %v348_v39 = vadd.f32 %v3497_v50, %v2424_v31  ;;  %v723_v46 = vadd.f32 %v722_v2, %v2567_v61  ;;  %v765_v24 = vrot.slane %v764_v47, 2  ;;  %v945_v36 = vrot.slane %v944_v42, 2  ;;  %v881_v61 = vpop.permute.xlu0 %880 }
 0x103   : > { %v3498_v53 = vrot.slane %v2399_v6, 4  ;;  %v950_v58 = vrot.slane %v2613_v17, 4  ;;  %v957_v31 = vrot.slane %v2616_v13, 4  ;;  %v546_v43 = vadd.f32 %v545_v23, %v544_v40 }
 0x104   : > { %v923_v22 = vrot.slane %v922_v15, 2  ;;  %426 = vrot.lane.b32.xlu0 %v366_v3, %s2224_s25  ;;  %v524_v32 = vadd.f32 %v523_v20, %v522_v18  ;;  %v588_v26 = vadd.f32 %v587_v19, %v586_v57  ;;  %v787_v11 = vadd.f32 %v786_v49, %v2579_v7 }
 0x105   : > { %v326_v28 = vadd.f32 %v3498_v53, %v2399_v6  ;;  %v349_v33 = vrot.slane %v348_v39, 2  ;;  %621 = vrot.lane.b32.xlu1 %v546_v43, %s2225_s26  ;;  %v566_v52 = vrot.slane %v565_v5, 1  ;;  %v746_v10 = vrot.slane %v745_v44, 1 }
 0x106   : > { %v889_v6 = vsel %vm886_vm11, %v884_v0, %v879_v45  ;;  %v3499_v12 = vrot.slane %v2420_v27, 4  ;;  %v724_v34 = vrot.slane %v723_v46, 1  ;;  %v766_v40 = vadd.f32 %v765_v24, %v764_v47 }
 0x107   : > { %v946_v63 = vadd.f32 %v945_v36, %v944_v42  ;;  %v327_v29 = vrot.slane %v326_v28, 2  ;;  %v924_v18 = vadd.f32 %v923_v22, %v922_v15  ;;  %v3500_v7 = vrot.slane %v2394_v1, 4  ;;  %v2650_v42 = vpop.permute.xlu1 %1077 }
 0x108   : > { %v390_v38 = vadd.f32 %v3499_v12, %v2420_v27  ;;  %v3501_v30 = vrot.slane %v2445_v55, 4  ;;  %v885_v2 = vrot.slane %v881_v61, 4  ;;  %615 = vrot.lane.b32.xlu0 %v524_v32, %s2225_s26  ;;  %v788_v45 = vrot.slane %v787_v11, 1 }
 0x109   : > { %v369_v57 = vadd.f32 %v3500_v7, %v2394_v1  ;;  %v350_v48 = vadd.f32 %v349_v33, %v348_v39  ;;  %v903_v27 = vmul.f32 %v889_v6, %v2370_v37  ;;  %v3502_v47 = vrot.slane %v2449_v59, 4  ;;  %633 = vrot.lane.b32.xlu1 %v588_v26, %s2225_s26 }
 0x10a   : > { %v549_v56 = vadd.f32 %v3501_v30, %v2445_v55  ;;  %v567_v1 = vadd.f32 %v566_v52, %v565_v5  ;;  %v747_v23 = vadd.f32 %v746_v10, %v745_v44  ;;  %v904_v55 = vmul.f32 %v884_v0, %v2374_v41 }
 0x10b   : > { %v527_v15 = vadd.f32 %v3502_v47, %v2449_v59  ;;  %v391_v20 = vrot.slane %v390_v38, 2  ;;  %v767_v19 = vrot.slane %v766_v40, 1  ;;  %v947_v49 = vrot.slane %v946_v63, 1 }
 0x10c   : > { %v328_v50 = vadd.f32 %v327_v29, %v326_v28  ;;  %v890_v39 = vsel %vm886_vm11, %v885_v2, %v881_v61  ;;  %v725_v3 = vadd.f32 %v724_v34, %v723_v46  ;;  %v925_v24 = vrot.slane %v924_v18, 1  ;;  %627 = vrot.lane.b32.xlu0 %v567_v1, %s2225_s26 }
 0x10d   : > { %v370_v36 = vrot.slane %v369_v57, 2  ;;  %v550_v53 = vrot.slane %v549_v56, 2  ;;  %v789_v59 = vadd.f32 %v788_v45, %v787_v11  ;;  %v351_v43 = vrot.slane %v350_v48, 1  ;;  %822 = vrot.lane.b32.xlu1 %v747_v23, %s2226_s27  ;;  %v1076_v11 = vpop.permute.xlu1 %1075 }
 0x10e   : > { %v963_v22 = vsel %vm919_vm12, %v903_v27, 0.0  ;;  %v528_v5 = vrot.slane %v527_v15, 2  ;;  %v913_v44 = vcombine.high %v903_v27, %v903_v27  ;;  %v2659_v0 = vsel %vm934_vm10, %v904_v55, 0.0 }
 0x10f   : > { %v392_v28 = vadd.f32 %v391_v20, %v390_v38  ;;  %v905_v32 = vmul.f32 %v890_v39, %v2370_v37  ;;  %v768_v46 = vadd.f32 %v767_v19, %v766_v40  ;;  %v948_v26 = vadd.f32 %v947_v49, %v946_v63 }
 0x110   : > { %v329_v33 = vrot.slane %v328_v50, 1  ;;  %v1084_v61 = vrot.slane %v2650_v42, 4  ;;  %v926_v52 = vadd.f32 %v925_v24, %v924_v18  ;;  %v964_v10 = vrot.slane %v963_v22, 4  ;;  %816 = vrot.lane.b32.xlu0 %v725_v3, %s2226_s27 }
 0x111   : > { %v371_v6 = vadd.f32 %v370_v36, %v369_v57  ;;  %v551_v12 = vadd.f32 %v550_v53, %v549_v56  ;;  %v352_v34 = vadd.f32 %v351_v43, %v350_v48  ;;  %v978_v29 = vrot.slane %v2659_v0, 4  ;;  %834 = vrot.lane.b32.xlu1 %v789_v59, %s2226_s27 }
 0x112   : > { %v529_v38 = vadd.f32 %v528_v5, %v527_v15  ;;  %v906_v7 = vmul.f32 %v885_v2, %v2374_v41  ;;  %v2668_v40 = vsel %vm197_vm4, %v913_v44, 0.0  ;;  %v393_v63 = vrot.slane %v392_v28, 1 }
 0x113   : > { %v984_v18 = vsel %vm919_vm12, %v905_v32, 0.0  ;;  %v1083_v30 = vrot.slane %v1076_v11, 4  ;;  %v330_v57 = vadd.f32 %v329_v33, %v328_v50  ;;  %v914_v56 = vcombine.high %v905_v32, %v905_v32  ;;  %v2707_v32 = vpop.permute.xlu0 %1079 }
 0x114   : > { %v1089_v45 = vsel %vm1087_vm13, %v1084_v61, %v2650_v42  ;;  %v3503_v48 = vrot.slane %v2469_v25, 4  ;;  %v2676_v47 = vadd.f32 %v964_v10, %v963_v22  ;;  %v372_v2 = vrot.slane %v371_v6, 1  ;;  %828 = vrot.lane.b32.xlu0 %v768_v46, %s2226_s27 }
 0x115   : > { %v552_v15 = vrot.slane %v551_v12, 1  ;;  %v3504_v1 = vrot.slane %v2473_v35, 4  ;;  %vm1288_vm0 = vcmask 261120   ;;  %v971_v55 = vrot.slane %v2668_v40, 4  ;;  %1023 = vrot.lane.b32.xlu1 %v948_v26, %s2227_s28 }
 0x116   : > { %v591_v27 = vadd.f32 %v3503_v48, %v2469_v25  ;;  %v530_v20 = vrot.slane %v529_v38, 1  ;;  %v985_v19 = vrot.slane %v984_v18, 4  ;;  %v2684_v42 = vsel %vm934_vm10, %v906_v7, 0.0 }
 0x117   : > { %v570_v23 = vadd.f32 %v3504_v1, %v2473_v35  ;;  %v394_v25 = vadd.f32 %v393_v63, %v392_v28  ;;  %v1102_v49 = vmul.f32 %v1089_v45, %v2370_v37  ;;  %v1088_v50 = vsel %vm1087_vm13, %v1083_v30, %v1076_v11  ;;  %v1279_v28 = vpop.permute.xlu1 %1278 }
 0x118   : > { %v750_v35 = vadd.f32 %v749_v21, %v2499_v8  ;;  %v2693_v39 = vsel %vm197_vm4, %v914_v56, 0.0  ;;  %v1103_v3 = vmul.f32 %v1084_v61, %v2374_v41  ;;  %v592_v24 = vrot.slane %v591_v27, 2  ;;  %1017 = vrot.lane.b32.xlu0 %v926_v52, %s2227_s28 }
 0x119   : > { %v728_v36 = vadd.f32 %v727_v4, %v2563_v16  ;;  %v373_v53 = vadd.f32 %v372_v2, %v371_v6  ;;  %v553_v59 = vadd.f32 %v552_v15, %v551_v12  ;;  %v999_v43 = vrot.slane %v2684_v42, 4  ;;  %416 = vrot.lane.b32.xlu1 %v330_v57, %s2224_s25 }
 0x11a   : > { %v571_v22 = vrot.slane %v570_v23, 2  ;;  %v531_v5 = vadd.f32 %v530_v20, %v529_v38  ;;  %v2701_v44 = vadd.f32 %v985_v19, %v984_v18  ;;  %v1100_v8 = vmul.f32 %v1088_v50, %v2370_v37 }
 0x11b   : > { %v792_v21 = vadd.f32 %v791_v14, %v2576_v60  ;;  %v992_v16 = vrot.slane %v2693_v39, 4  ;;  %v1113_v4 = vcombine.high %v1102_v49, %v1102_v49  ;;  %v1143_v46 = vsel %vm1120_vm14, %v1102_v49, 0.0 }
 0x11c   : > { %v751_v26 = vrot.slane %v750_v35, 2  ;;  %v2713_v33 = vsel %vm1135_vm15, %v1103_v3, 0.0  ;;  %v593_v61 = vadd.f32 %v592_v24, %v591_v27  ;;  %v1101_v11 = vmul.f32 %v1083_v30, %v2374_v41  ;;  %422 = vrot.lane.b32.xlu0 %v352_v34, %s2224_s25 }
 0x11d   : > { %v729_v52 = vrot.slane %v728_v36, 2  ;;  %v572_v10 = vadd.f32 %v571_v22, %v570_v23  ;;  %v771_v60 = vadd.f32 %v770_v9, %v2594_v62  ;;  %vm1321_vm1 = vcmask 1043712   ;;  %428 = vrot.lane.b32.xlu1 %v373_v53, %s2224_s25  ;;  %v1277_v22 = vpop.permute.xlu1 %1276 }
 0x11e   : > { %v1285_v14 = vrot.slane %v1279_v28, 4  ;;  %v1085_v6 = vrot.slane %v2707_v32, 4  ;;  %v1121_v12 = vsel %vm1120_vm14, %v1100_v8, 0.0  ;;  %v793_v38 = vrot.slane %v792_v21, 2 }
 0x11f   : > { %v951_v7 = vadd.f32 %v950_v58, %v2613_v17  ;;  %v929_v63 = vadd.f32 %v928_v54, %v2599_v51  ;;  %v1144_v62 = vrot.slane %v1143_v46, 4  ;;  %v1112_v18 = vcombine.high %v1100_v8, %v1100_v8 }
 0x120   : > { %v752_v30 = vadd.f32 %v751_v26, %v750_v35  ;;  %v2731_v34 = vsel %vm197_vm4, %v1113_v4, 0.0  ;;  %v594_v57 = vrot.slane %v593_v61, 1  ;;  %v730_v56 = vadd.f32 %v729_v52, %v728_v36  ;;  %434 = vrot.lane.b32.xlu0 %v394_v25, %s2224_s25 }
 0x121   : > { %vm1336_vm2 = vcmask 257024   ;;  %v1290_v45 = vsel %vm1288_vm0, %v1285_v14, %v1279_v28  ;;  %v573_v17 = vrot.slane %v572_v10, 1  ;;  %v1122_v58 = vrot.slane %v1121_v12, 4  ;;  %617 = vrot.lane.b32.xlu1 %v531_v5, %s2225_s26 }
 0x122   : > { %v772_v48 = vrot.slane %v771_v60, 2  ;;  %v1090_v51 = vsel %vm1087_vm13, %v1085_v6, %v2707_v32  ;;  %v2738_v54 = vsel %vm1135_vm15, %v1101_v11, 0.0  ;;  %v794_v27 = vadd.f32 %v793_v38, %v792_v21 }
 0x123   : > { %v952_v2 = vrot.slane %v951_v7, 2  ;;  %v930_v15 = vrot.slane %v929_v63, 2  ;;  %v2741_v1 = vadd.f32 %v1144_v62, %v1143_v46  ;;  %v2744_v23 = vsel %vm197_vm4, %v1112_v18, 0.0 }
 0x124   : > { %v753_v20 = vrot.slane %v752_v30, 1  ;;  %v1303_v19 = vmul.f32 %v1290_v45, %v2370_v37  ;;  %v1151_v49 = vrot.slane %v2731_v34, 4  ;;  %v595_v50 = vadd.f32 %v594_v57, %v593_v61  ;;  %623 = vrot.lane.b32.xlu0 %v553_v59, %s2225_s26 }
 0x125   : > { %v731_v25 = vrot.slane %v730_v56, 1  ;;  %v1104_v35 = vmul.f32 %v1090_v51, %v2370_v37  ;;  %v574_v3 = vadd.f32 %v573_v17, %v572_v10  ;;  %v2749_v24 = vadd.f32 %v1122_v58, %v1121_v12  ;;  %v1082_v12 = vpop.permute.xlu0 %1081 }
 0x126   : > { %v1137_v36 = vrot.slane %v2738_v54, 4  ;;  %v773_v53 = vadd.f32 %v772_v48, %v771_v60  ;;  %v1129_v5 = vrot.slane %v2744_v23, 4  ;;  %v795_v8 = vrot.slane %v794_v27, 1 }
 0x127   : > { %v953_v21 = vadd.f32 %v952_v2, %v951_v7  ;;  %v931_v28 = vadd.f32 %v930_v15, %v929_v63  ;;  %629 = vrot.lane.b32.xlu1 %v574_v3, %s2225_s26  ;;  %v754_v32 = vadd.f32 %v753_v20, %v752_v30  ;;  %v1304_v4 = vmul.f32 %v1285_v14, %v2374_v41  ;;  %v1480_v2 = vpop.permute.xlu1 %1479  ;;  %v2793_v20 = vld [vmem:[%s2359_s22] sm:$0xff] }
 0x128   : > { %v1314_v37 = vcombine.high %v1303_v19, %v1303_v19  ;;  %v958_v46 = vadd.f32 %v957_v31, %v2616_v13  ;;  %v732_v26 = vadd.f32 %v731_v25, %v730_v56  ;;  %v1344_v61 = vsel %vm1321_vm1, %v1303_v19, 0.0  ;;  %635 = vrot.lane.b32.xlu0 %v595_v50, %s2225_s26 }
 0x129   : > { %v1164_v59 = vsel %vm1120_vm14, %v1104_v35, 0.0  ;;  %v1284_v11 = vrot.slane %v1277_v22, 4  ;;  %v774_v52 = vrot.slane %v773_v53, 1  ;;  %v1114_v10 = vcombine.high %v1104_v35, %v1104_v35 }
 0x12a   : > { %v959_v60 = vrot.slane %v958_v46, 2  ;;  %v972_v38 = vadd.f32 %v971_v55, %v2668_v40  ;;  %v796_v14 = vadd.f32 %v795_v8, %v794_v27  ;;  %v954_v7 = vrot.slane %v953_v21, 1 }
 0x12b   : > { %v932_v63 = vrot.slane %v931_v28, 1  ;;  %v1105_v13 = vmul.f32 %v1085_v6, %v2374_v41  ;;  %818 = vrot.lane.b32.xlu1 %v732_v26, %s2226_s27  ;;  %v1345_v31 = vrot.slane %v1344_v61, 4  ;;  %v2768_v62 = vsel %vm197_vm4, %v1314_v37, 0.0 }
 0x12c   : > { %v2771_v18 = vsel %vm1336_vm2, %v1304_v4, 0.0  ;;  %v1165_v30 = vrot.slane %v1164_v59, 4  ;;  %v966_v57 = vrot.slane %v2676_v47, 2  ;;  %v1289_v40 = vsel %vm1288_vm0, %v1284_v11, %v1277_v22  ;;  %824 = vrot.lane.b32.xlu0 %v754_v32, %s2226_s27  ;;  %v2802_v32 = vld [vmem:[%s2359_s22 + $0x8] sm:$0xf]  ;;  %s2007_s22 = sshll.u32 %s2269_s13, 7 }
 0x12d   : > { %v1086_v55 = vrot.slane %v1082_v12, 4  ;;  %v979_v41 = vadd.f32 %v978_v29, %v2659_v0  ;;  %v775_v6 = vadd.f32 %v774_v52, %v773_v53  ;;  %v2779_v56 = vsel %vm197_vm4, %v1114_v10, 0.0  ;;  %v1281_v53 = vpop.permute.xlu0 %1280  ;;  %s3431_s19 = scalar_lea.hbm %s3470_s2, %s2007_s22  ;;  %s2232_s13 = smov [#allocation7]  }
 0x12e   : > { %v960_v45 = vadd.f32 %v959_v60, %v958_v46  ;;  %v973_v17 = vrot.slane %v972_v38, 2  ;;  %v955_v58 = vadd.f32 %v954_v7, %v953_v21  ;;  %v933_v48 = vadd.f32 %v932_v63, %v931_v28  ;;  %v1478_v60 = vpop.permute.xlu1 %1477  ;;  %s2146_s24 = sshll.u32 %s2232_s13, 4  ;;  %s2147_s24 = int_to_ptr.vmem [resolvable:$false] %s2146_s24 }
 0x12f   : > { %v2784_v27 = vsel %vm1135_vm15, %v1105_v13, 0.0  ;;  %830 = vrot.lane.b32.xlu1 %v775_v6, %s2226_s27  ;;  %v2787_v0 = vadd.f32 %v1345_v31, %v1344_v61  ;;  %v2790_v15 = vadd.f32 %v1165_v30, %v1164_v59  ;;  %v1301_v19 = vmul.f32 %v2793_v20, %v1289_v40  ;;  %s2148_s25 = scalar_lea.vmem %s2147_s24, 256  ;;  %p2149_p10 = scmp.lt.s32.totalorder %s1915_s6, %s2147_s24 }
 0x130   : > { %v967_v25 = vadd.f32 %v966_v57, %v2676_v47  ;;  %v1091_v35 = vsel %vm1087_vm13, %v1086_v55, %v1082_v12  ;;  %v980_v3 = vrot.slane %v979_v41, 2  ;;  %v961_v8 = vrot.slane %v960_v45, 1  ;;  %836 = vrot.lane.b32.xlu0 %v796_v14, %s2226_s27  ;;  %p2150_p2 = scmp.lt.s32.totalorder %s2148_s25, %s2142_s23 }
 0x131   : > { %v974_v21 = vadd.f32 %v973_v17, %v972_v38  ;;  %v1486_v28 = vrot.slane %v1480_v2, 4  ;;  %v1302_v4 = vmul.f32 %v2802_v32, %v1284_v11  ;;  %vm1489_vm3 = vcmask 269312  }
 0x132   : > { %v993_v47 = vadd.f32 %v992_v16, %v2693_v39  ;;  %v987_v37 = vrot.slane %v2701_v44, 2  ;;  %v1322_v46 = vsel %vm1321_vm1, %v1301_v19, 0.0  ;;  %v1106_v26 = vmul.f32 %v2793_v20, %v1091_v35  ;;  %p2151_p13 = por %p2150_p2, %p2149_p10 }
 0x133   : > { %1019 = vrot.lane.b32.xlu1 %v933_v48, %s2227_s28  ;;  %vm1522_vm5 = vcmask 1043720   ;;  %v1286_v61 = vrot.slane %v1281_v53, 4  ;;  %v968_v59 = vrot.slane %v967_v25, 1  ;;  %v1107_v52 = vmul.f32 %v2802_v32, %v1086_v55 }
 0x134   : > { %v981_v10 = vadd.f32 %v980_v3, %v979_v41  ;;  %v994_v11 = vrot.slane %v993_v47, 2  ;;  %v962_v12 = vadd.f32 %v961_v8, %v960_v45  ;;  %v1313_v38 = vcombine.high %v1301_v19, %v1301_v19  ;;  %1025 = vrot.lane.b32.xlu0 %v955_v58, %s2227_s28  ;;  %p2152_p0 = pnand %p2151_p13, %p2145_p7 }
 0x135   : > { %v975_v14 = vrot.slane %v974_v21, 1  ;;  %v1491_v39 = vsel %vm1489_vm3, %v1486_v28, %v1480_v2  ;;  %v1323_v16 = vrot.slane %v1322_v46, 4  ;;  %v2816_v7 = vsel %vm1336_vm2, %v1302_v4, 0.0 }
 0x136   : > { %v1505_v63 = vmul.f32 %v2802_v32, %v1486_v28  ;;  %v988_v13 = vadd.f32 %v987_v37, %v2701_v44  ;;  %v1185_v31 = vsel %vm1120_vm14, %v1106_v26, 0.0  ;;  %vm1537_vm6 = vcmask 265216  }
 0x137   : > { %1027 = vrot.lane.b32.xlu1 %v962_v12, %s2227_s28  ;;  %v1291_v30 = vsel %vm1288_vm0, %v1286_v61, %v1281_v53  ;;  %v1485_v57 = vrot.slane %v1478_v60, 4  ;;  %v969_v40 = vadd.f32 %v968_v59, %v967_v25  ;;  %v982_v55 = vrot.slane %v981_v10, 1 }
 0x138   : > { %v1504_v41 = vmul.f32 %v2793_v20, %v1491_v39  ;;  %v995_v6 = vadd.f32 %v994_v11, %v993_v47  ;;  %v2825_v45 = vsel %vm197_vm4, %v1313_v38, 0.0  ;;  %v1115_v58 = vcombine.high %v1106_v26, %v1106_v26 }
 0x139   : > { %v976_v44 = vadd.f32 %v975_v14, %v974_v21  ;;  %1029 = vrot.lane.b32.xlu0 %v969_v40, %s2227_s28  ;;  %v1186_v48 = vrot.slane %v1185_v31, 4  ;;  %v1559_v2 = vsel %vm1537_vm6, %v1505_v63, 0.0  ;;  %v1305_v19 = vmul.f32 %v2793_v20, %v1291_v30 }
 0x13a   : > { %v989_v35 = vrot.slane %v988_v13, 1  ;;  %v2831_v25 = vadd.f32 %v1323_v16, %v1322_v46  ;;  %v2834_v3 = vsel %vm1135_vm15, %v1107_v52, 0.0  ;;  %v1306_v53 = vmul.f32 %v2802_v32, %v1286_v61  ;;  %v1283_v46 = vpop.permute.xlu0 %1282 }
 0x13b   : > { %1031 = vrot.lane.b32.xlu1 %v976_v44, %s2227_s28  ;;  %v1490_v8 = vsel %vm1489_vm3, %v1485_v57, %v1478_v60  ;;  %v983_v28 = vadd.f32 %v982_v55, %v981_v10  ;;  %v1545_v4 = vsel %vm1522_vm5, %v1504_v41, 0.0  ;;  %v996_v47 = vrot.slane %v995_v6, 1 }
 0x13c   : > { %v1515_v37 = vcombine.high %v1504_v41, %v1504_v41  ;;  %v1560_v26 = vrot.slane %v1559_v2, 4  ;;  %v990_v59 = vadd.f32 %v989_v35, %v988_v13  ;;  %v1124_v11 = vrot.slane %v2749_v24, 2 }
 0x13d   : > { %v2843_v52 = vsel %vm197_vm4, %v1115_v58, 0.0  ;;  %1033 = vrot.lane.b32.xlu0 %v983_v28, %s2227_s28  ;;  %v1315_v61 = vcombine.high %v1305_v19, %v1305_v19  ;;  %v1502_v60 = vmul.f32 %v2793_v20, %v1490_v8  ;;  %v1000_v10 = vadd.f32 %v999_v43, %v2684_v42  ;;  %v1681_v8 = vpop.permute.xlu1 %1680 }
 0x13e   : > { %v2850_v12 = vadd.f32 %v1186_v48, %v1185_v31  ;;  %v1546_v38 = vrot.slane %v1545_v4, 4  ;;  %v1365_v14 = vsel %vm1321_vm1, %v1305_v19, 0.0  ;;  %v1379_v39 = vsel %vm1336_vm2, %v1306_v53, 0.0 }
 0x13f   : > { %1035 = vrot.lane.b32.xlu1 %v990_v59, %s2227_s28  ;;  %v997_v16 = vadd.f32 %v996_v47, %v995_v6  ;;  %v1503_v63 = vmul.f32 %v2802_v32, %v1485_v57  ;;  %v1287_v13 = vrot.slane %v1283_v46, 4  ;;  %v1125_v30 = vadd.f32 %v1124_v11, %v2749_v24 }
 0x140   : > { %v1552_v55 = vsel %vm197_vm4, %v1515_v37, 0.0  ;;  %v2859_v42 = vadd.f32 %v1560_v26, %v1559_v2  ;;  %v1001_v43 = vrot.slane %v1000_v10, 2  ;;  %v1366_v31 = vrot.slane %v1365_v14, 4 }
 0x141   : > { %v1372_v41 = vsel %vm197_vm4, %v1315_v61, 0.0  ;;  %v1380_v58 = vrot.slane %v1379_v39, 4  ;;  %1037 = vrot.lane.b32.xlu0 %v997_v16, %s2227_s28  ;;  %v1523_v6 = vsel %vm1522_vm5, %v1502_v60, 0.0  ;;  %v2865_v44 = vadd.f32 %v1546_v38, %v1545_v4 }
 0x142   : > { %v1514_v24 = vcombine.high %v1502_v60, %v1502_v60  ;;  %v1126_v48 = vrot.slane %v1125_v30, 1  ;;  %v1538_v19 = vsel %vm1537_vm6, %v1503_v63, 0.0  ;;  %v1292_v2 = vsel %vm1288_vm0, %v1287_v13, %v1283_v46  ;;  %v1482_v60 = vpop.permute.xlu0 %1481 }
 0x143   : > { %v1308_v35 = vmul.f32 %v2802_v32, %v1287_v13  ;;  %v1002_v53 = vadd.f32 %v1001_v43, %v1000_v10  ;;  %v1553_v28 = vrot.slane %v1552_v55, 4  ;;  %v1373_v47 = vrot.slane %v1372_v41, 4 }
 0x144   : > { %v1524_v37 = vrot.slane %v1523_v6, 4  ;;  %v1127_v26 = vadd.f32 %v1126_v48, %v1125_v30  ;;  %v2871_v11 = vadd.f32 %v1366_v31, %v1365_v14  ;;  %v2873_v4 = vadd.f32 %v1380_v58, %v1379_v39 }
 0x145   : > { %v1003_v61 = vrot.slane %v1002_v53, 1  ;;  %v1530_v38 = vsel %vm197_vm4, %v1514_v24, 0.0  ;;  %v1539_v16 = vrot.slane %v1538_v19, 4  ;;  %v1307_v46 = vmul.f32 %v2793_v20, %v1292_v2 }
 0x146   : > { %1218 = vrot.lane.b32.xlu0 %v1127_v26, %s2228_s3  ;;  %v1138_v10 = vadd.f32 %v1137_v36, %v2738_v54  ;;  %v1400_v63 = vsel %vm1336_vm2, %v1308_v35, 0.0  ;;  %v1687_v13 = vrot.slane %v1681_v8, 4  ;;  %v1130_v39 = vadd.f32 %v1129_v5, %v2744_v23  ;;  %v1679_v36 = vpop.permute.xlu1 %1678 }
 0x147   : > { %v1004_v14 = vadd.f32 %v1003_v61, %v1002_v53  ;;  %v2886_v43 = vadd.f32 %v1524_v37, %v1523_v6  ;;  %vm1690_vm7 = vcmask 277504   ;;  %v2888_v58 = vadd.f32 %v1553_v28, %v1552_v55 }
 0x148   : > { %v1139_v31 = vrot.slane %v1138_v10, 2  ;;  %v2890_v24 = vadd.f32 %v1373_v47, %v1372_v41  ;;  %v1531_v48 = vrot.slane %v1530_v38, 4  ;;  %v1487_v54 = vrot.slane %v1482_v60, 4  ;;  %v1484_v41 = vpop.permute.xlu0 %1483 }
 0x149   : > { %1039 = vrot.lane.b32.xlu1 %v1004_v14, %s2227_s28  ;;  %v1316_v35 = vcombine.high %v1307_v46, %v1307_v46  ;;  %v1386_v23 = vsel %vm1321_vm1, %v1307_v46, 0.0  ;;  %v1401_v5 = vrot.slane %v1400_v63, 4  ;;  %v2896_v53 = vadd.f32 %v1539_v16, %v1538_v19 }
 0x14a   : > { %v1692_v55 = vsel %vm1690_vm7, %v1687_v13, %v1681_v8  ;;  %v1131_v28 = vrot.slane %v1130_v39, 2  ;;  %v1706_v37 = vmul.f32 %v2802_v32, %v1687_v13  ;;  %v1140_v26 = vadd.f32 %v1139_v31, %v1138_v10 }
 0x14b   : > { %v1686_v61 = vrot.slane %v1679_v36, 4  ;;  %v2901_v14 = vadd.f32 %v1531_v48, %v1530_v38  ;;  %v1387_v59 = vrot.slane %v1386_v23, 4  ;;  %vm1738_vm8 = vcmask 273408  }
 0x14c   : > { %v1492_v46 = vsel %vm1489_vm3, %v1487_v54, %v1482_v60  ;;  %v1393_v30 = vsel %vm197_vm4, %v1316_v35, 0.0  ;;  %v2905_v19 = vadd.f32 %v1401_v5, %v1400_v63  ;;  %v1705_v8 = vmul.f32 %v2793_v20, %v1692_v55  ;;  %v2915_v55 = vpop.permute.xlu0 %1682 }
 0x14d   : > { %v1141_v16 = vrot.slane %v1140_v26, 1  ;;  %vm1723_vm9 = vcmask 1043728   ;;  %v1507_v13 = vmul.f32 %v2802_v32, %v1487_v54  ;;  %v1132_v10 = vadd.f32 %v1131_v28, %v1130_v39 }
 0x14e   : > { %v1760_v38 = vsel %vm1738_vm8, %v1706_v37, 0.0  ;;  %v1506_v31 = vmul.f32 %v2793_v20, %v1492_v46  ;;  %v1691_v60 = vsel %vm1690_vm7, %v1686_v61, %v1679_v36  ;;  %v2913_v47 = vadd.f32 %v1387_v59, %v1386_v23 }
 0x14f   : > { %v1142_v48 = vadd.f32 %v1141_v16, %v1140_v26  ;;  %v1394_v63 = vrot.slane %v1393_v30, 4  ;;  %v1133_v35 = vrot.slane %v1132_v10, 1  ;;  %v1488_v5 = vrot.slane %v1484_v41, 4 }
 0x150   : > { %v1716_v2 = vcombine.high %v1705_v8, %v1705_v8  ;;  %v1152_v39 = vadd.f32 %v1151_v49, %v2731_v34  ;;  %v1146_v54 = vrot.slane %v2741_v1, 2  ;;  %v1746_v36 = vsel %vm1723_vm9, %v1705_v8, 0.0 }
 0x151   : > { %1222 = vrot.lane.b32.xlu0 %v1142_v48, %s2228_s3  ;;  %v1761_v59 = vrot.slane %v1760_v38, 4  ;;  %v1134_v23 = vadd.f32 %v1133_v35, %v1132_v10  ;;  %v1703_v28 = vmul.f32 %v2793_v20, %v1691_v60  ;;  %v1566_v37 = vsel %vm1522_vm5, %v1506_v31, 0.0  ;;  %v2929_v48 = vpop.permute.xlu1 %1684  ;;  %v2935_v60 = vpop.permute.xlu0 %418 }
 0x152   : > { %v1580_v26 = vsel %vm1537_vm6, %v1507_v13, 0.0  ;;  %v1704_v46 = vmul.f32 %v2802_v32, %v1686_v61  ;;  %v1493_v16 = vsel %vm1489_vm3, %v1488_v5, %v1484_v41  ;;  %v1509_v49 = vmul.f32 %v2802_v32, %v1488_v5 }
 0x153   : > { %1220 = vrot.lane.b32.xlu1 %v1134_v23, %s2228_s3  ;;  %v1508_v34 = vmul.f32 %v2793_v20, %v1493_v16  ;;  %v1153_v8 = vrot.slane %v1152_v39, 2  ;;  %v1147_v10 = vadd.f32 %v1146_v54, %v2741_v1  ;;  %v2938_v13 = vadd.f32 %v1394_v63, %v1393_v30 }
 0x154   : > { %v1747_v61 = vrot.slane %v1746_v36, 4  ;;  %v1516_v6 = vcombine.high %v1506_v31, %v1506_v31  ;;  %v1753_v41 = vsel %vm197_vm4, %v1716_v2, 0.0  ;;  %v1581_v17 = vrot.slane %v1580_v26, 4 }
 0x155   : > { %v1724_v23 = vsel %vm1723_vm9, %v1703_v28, 0.0  ;;  %v1154_v21 = vadd.f32 %v1153_v8, %v1152_v39  ;;  %v2942_v16 = vadd.f32 %v1761_v59, %v1760_v38  ;;  %v1567_v5 = vrot.slane %v1566_v37, 4 }
 0x156   : > { %v1715_v40 = vcombine.high %v1703_v28, %v1703_v28  ;;  %v1739_v1 = vsel %vm1738_vm8, %v1704_v46, 0.0  ;;  %v1587_v35 = vsel %vm1522_vm5, %v1508_v34, 0.0  ;;  %v1601_v30 = vsel %vm1537_vm6, %v1509_v49, 0.0 }
 0x157   : > { %v2945_v54 = vpop.permute.xlu1 %424  ;;  %v1155_v63 = vrot.slane %v1154_v21, 1  ;;  %v1148_v31 = vrot.slane %v1147_v10, 1  ;;  %v2949_v57 = vadd.f32 %v1747_v61, %v1746_v36  ;;  %v1573_v2 = vsel %vm197_vm4, %v1516_v6, 0.0 }
 0x158   : > { %v1725_v29 = vrot.slane %v1724_v23, 4  ;;  %v1517_v39 = vcombine.high %v1508_v34, %v1508_v34  ;;  %v1689_v28 = vrot.slane %v2929_v48, 4  ;;  %v1688_v46 = vrot.slane %v2915_v55, 4 }
 0x159   : > { %v1156_v38 = vadd.f32 %v1155_v63, %v1154_v21  ;;  %v1149_v59 = vadd.f32 %v1148_v31, %v1147_v10  ;;  %v1731_v51 = vsel %vm197_vm4, %v1715_v40, 0.0  ;;  %v1740_v50 = vrot.slane %v1739_v1, 4 }
 0x15a   : > { %v2954_v8 = vpop.permute.xlu0 %430  ;;  %v1588_v49 = vrot.slane %v1587_v35, 4  ;;  %v1602_v22 = vrot.slane %v1601_v30, 4  ;;  %v1754_v36 = vrot.slane %v1753_v41, 4  ;;  %v2960_v61 = vadd.f32 %v1567_v5, %v1566_v37 }
 0x15b   : > { %3505 = vst [vmem:[#allocation11_spill] sm:$0xff] %v2954_v8  ;;  %v2957_v9 = vpop.permute.xlu1 %436  ;;  %v2962_v21 = vadd.f32 %v1581_v17, %v1580_v26  ;;  %1226 = vrot.lane.b32.xlu0 %v1156_v38, %s2228_s3  ;;  %1224 = vrot.lane.b32.xlu1 %v1149_v59, %s2228_s3  ;;  %v1574_v34 = vrot.slane %v1573_v2, 4  ;;  %v2966_v10 = vadd.f32 %v1725_v29, %v1724_v23  ;;  %v1594_v40 = vsel %vm197_vm4, %v1517_v39, 0.0 }
 0x15c   : > { %v1167_v63 = vrot.slane %v2790_v15, 2  ;;  %v1732_v8 = vrot.slane %v1731_v51, 4  ;;  %v1694_v37 = vsel %vm1690_vm7, %v1689_v28, %v2929_v48  ;;  %v3507_v17 = vrot.slane %v2713_v33, 4 }
 0x15d   : > { %3506 = vst [vmem:[#allocation12_spill] sm:$0xff] %v2966_v10  ;;  %v2978_v38 = vadd.f32 %v1740_v50, %v1739_v1  ;;  %v2980_v29 = vadd.f32 %v1588_v49, %v1587_v35  ;;  %v2982_v23 = vadd.f32 %v1602_v22, %v1601_v30  ;;  %v1693_v39 = vsel %vm1690_vm7, %v1688_v46, %v2915_v55 }
 0x15e   : > { %v1159_v26 = vadd.f32 %v3507_v17, %v2713_v33  ;;  %v2976_v5 = vpop.permute.xlu0 %619  ;;  %v2988_v6 = vadd.f32 %v1754_v36, %v1753_v41  ;;  %v1595_v31 = vrot.slane %v1594_v40, 4  ;;  %v1168_v33 = vadd.f32 %v1167_v63, %v2790_v15 }
 0x15f   : > { %3508 = vst [vmem:[#allocation13_spill] sm:$0xff] %v2978_v38  ;;  %v2986_v59 = vpop.permute.xlu1 %625  ;;  %v2993_v50 = vadd.f32 %v1574_v34, %v1573_v2  ;;  %v1709_v22 = vmul.f32 %v2793_v20, %v1694_v37  ;;  %v2997_v1 = vadd.f32 %v1732_v8, %v1731_v51  ;;  %v1707_v55 = vmul.f32 %v2793_v20, %v1693_v39 }
 0x160   : > { %v1169_v30 = vrot.slane %v1168_v33, 1  ;;  %v1160_v41 = vrot.slane %v1159_v26, 2  ;;  %v1710_v2 = vmul.f32 %v2802_v32, %v1689_v28  ;;  %v3008_v35 = vadd.f32 %v1595_v31, %v1594_v40 }
 0x161   : > { %3509 = vst [vmem:[#allocation14_spill] sm:$0xff] %v2997_v1  ;;  %v3512_v37 = vrot.slane %v2784_v27, 4  ;;  %v1718_v48 = vcombine.high %v1709_v22, %v1709_v22  ;;  %v1708_v17 = vmul.f32 %v2802_v32, %v1688_v46  ;;  %v3513_v36 = vrot.slane %v2779_v56, 4 }
 0x162   : > { %v3000_v49 = vpop.permute.xlu0 %631  ;;  %v1170_v51 = vadd.f32 %v1169_v30, %v1168_v33  ;;  %v1161_v8 = vadd.f32 %v1160_v41, %v1159_v26  ;;  %v1347_v63 = vrot.slane %v2787_v0, 2  ;;  %v1767_v28 = vsel %vm1723_vm9, %v1707_v55, 0.0 }
 0x163   : > { %3510 = vst [vmem:[#allocation15_spill] sm:$0xff] %v3000_v49  ;;  %v3006_v34 = vpop.permute.xlu1 %637  ;;  %v1180_v39 = vadd.f32 %v3512_v37, %v2784_v27  ;;  %v1173_v15 = vadd.f32 %v3513_v36, %v2779_v56  ;;  %v1188_v26 = vrot.slane %v2850_v12, 2  ;;  %v3515_v32 = vrot.slane %v2771_v18, 4 }
 0x164   : > { %3511 = vst [vmem:[#allocation16_spill] sm:$0xff] %v3006_v34  ;;  %1230 = vrot.lane.b32.xlu0 %v1170_v51, %s2228_s3  ;;  %v1162_v40 = vrot.slane %v1161_v8, 1  ;;  %v1348_v30 = vadd.f32 %v1347_v63, %v2787_v0  ;;  %v3516_v56 = vrot.slane %v2768_v62, 4  ;;  %v3518_v10 = vrot.slane %v2834_v3, 4 }
 0x165   : > { %v1181_v31 = vrot.slane %v1180_v39, 2  ;;  %v1174_v27 = vrot.slane %v1173_v15, 2  ;;  %v1360_v46 = vadd.f32 %v3515_v32, %v2771_v18  ;;  %v1189_v38 = vadd.f32 %v1188_v26, %v2850_v12 }
 0x166   : > { %v3021_v33 = vpop.permute.xlu0 %820  ;;  %v1353_v41 = vadd.f32 %v3516_v56, %v2768_v62  ;;  %v1163_v51 = vadd.f32 %v1162_v40, %v1161_v8  ;;  %v1788_v0 = vsel %vm1723_vm9, %v1709_v22, 0.0  ;;  %v1795_v18 = vsel %vm197_vm4, %v1718_v48, 0.0 }
 0x167   : > { %3514 = vst [vmem:[#allocation17_spill] sm:$0xff] %v3021_v33  ;;  %v3030_v36 = vpop.permute.xlu1 %826  ;;  %v1182_v37 = vadd.f32 %v1181_v31, %v1180_v39  ;;  %v1201_v33 = vadd.f32 %v3518_v10, %v2834_v3  ;;  %v1175_v63 = vadd.f32 %v1174_v27, %v1173_v15  ;;  %v1361_v49 = vrot.slane %v1360_v46, 2 }
 0x168   : > { %3517 = vst [vmem:[#allocation18_spill] sm:$0xff] %v3030_v36  ;;  %v1354_v1 = vrot.slane %v1353_v41, 2  ;;  %v1717_v32 = vcombine.high %v1707_v55, %v1707_v55  ;;  %1228 = vrot.lane.b32.xlu1 %v1163_v51, %s2228_s3  ;;  %v3519_v8 = vrot.slane %v2843_v52, 4  ;;  %v1768_v40 = vrot.slane %v1767_v28, 4 }
 0x169   : > { %v1183_v62 = vrot.slane %v1182_v37, 1  ;;  %v1781_v3 = vsel %vm1738_vm8, %v1708_v17, 0.0  ;;  %v1176_v10 = vrot.slane %v1175_v63, 1  ;;  %v1349_v22 = vrot.slane %v1348_v30, 1 }
 0x16a   : > { %v1194_v39 = vadd.f32 %v3519_v8, %v2843_v52  ;;  %v3042_v12 = vpop.permute.xlu0 %832  ;;  %v1190_v26 = vrot.slane %v1189_v38, 1  ;;  %v1362_v48 = vadd.f32 %v1361_v49, %v1360_v46  ;;  %v1202_v55 = vrot.slane %v1201_v33, 2 }
 0x16b   : > { %3520 = vst [vmem:[#allocation19_spill] sm:$0xff] %v3042_v12  ;;  %v3045_v15 = vpop.permute.xlu1 %838  ;;  %v1184_v31 = vadd.f32 %v1183_v62, %v1182_v37  ;;  %v1177_v27 = vadd.f32 %v1176_v10, %v1175_v63  ;;  %v1355_v56 = vadd.f32 %v1354_v1, %v1353_v41  ;;  %v3521_v36 = vrot.slane %v2825_v45, 4 }
 0x16c   : > { %v1195_v51 = vrot.slane %v1194_v39, 2  ;;  %v1789_v8 = vrot.slane %v1788_v0, 4  ;;  %v1796_v12 = vrot.slane %v1795_v18, 4  ;;  %v3051_v34 = vsel %vm1738_vm8, %v1710_v2, 0.0 }
 0x16d   : > { %v1331_v52 = vadd.f32 %v3521_v36, %v2825_v45  ;;  %3522 = vst [vmem:[#allocation20_spill] sm:$0xff] %v3051_v34  ;;  %v1774_v17 = vsel %vm197_vm4, %v1717_v32, 0.0  ;;  %1234 = vrot.lane.b32.xlu0 %v1184_v31, %s2228_s3  ;;  %v3057_v49 = vadd.f32 %v1768_v40, %v1767_v28  ;;  %v1782_v46 = vrot.slane %v1781_v3, 4  ;;  %1232 = vrot.lane.b32.xlu1 %v1177_v27, %s2228_s3 }
 0x16e   : > { %v3055_v37 = vpop.permute.xlu0 %1021  ;;  %v1350_v1 = vadd.f32 %v1349_v22, %v1348_v30  ;;  %v3524_v45 = vrot.slane %v2816_v7, 4  ;;  %v1191_v2 = vadd.f32 %v1190_v26, %v1189_v38  ;;  %v1363_v63 = vrot.slane %v1362_v48, 1 }
 0x16f   : > { %3523 = vst [vmem:[#allocation21_spill] sm:$0xff] %v3055_v37  ;;  %v3063_v36 = vpop.permute.xlu1 %420  ;;  %v1203_v62 = vadd.f32 %v1202_v55, %v1201_v33  ;;  %v1332_v32 = vrot.slane %v1331_v52, 2  ;;  %v1356_v10 = vrot.slane %v1355_v56, 1  ;;  %v1196_v31 = vadd.f32 %v1195_v51, %v1194_v39 }
 0x170   : > { %v1339_v41 = vadd.f32 %v3524_v45, %v2816_v7  ;;  %v1325_v37 = vrot.slane %v2831_v25, 2  ;;  %v3525_v28 = vrot.slane %v2871_v11, 2  ;;  %v1775_v22 = vrot.slane %v1774_v17, 4 }
 0x171   : > { %1425 = vrot.lane.b32.xlu0 %v1350_v1, %s2229_s4  ;;  %v1375_v38 = vrot.slane %v2890_v24, 2  ;;  %v3074_v33 = vadd.f32 %v1789_v8, %v1788_v0  ;;  %v3076_v39 = vadd.f32 %v1796_v12, %v1795_v18  ;;  %v3078_v55 = vadd.f32 %v1782_v46, %v1781_v3  ;;  %1236 = vrot.lane.b32.xlu1 %v1191_v2, %s2228_s3 }
 0x172   : > { %v1369_v40 = vadd.f32 %v3525_v28, %v2871_v11  ;;  %v1340_v7 = vrot.slane %v1339_v41, 2  ;;  %v3072_v26 = vpop.permute.xlu0 %414  ;;  %v1555_v11 = vrot.slane %v2888_v58, 2  ;;  %v1364_v1 = vadd.f32 %v1363_v63, %v1362_v48 }
 0x173   : > { %3526 = vst [vmem:[#allocation22_spill] sm:$0xff] %v3074_v33  ;;  %3527 = vst [vmem:[#allocation23_spill] sm:$0xff] %v3076_v39  ;;  %v3082_v27 = vpop.permute.xlu1 %432  ;;  %v1204_v45 = vrot.slane %v1203_v62, 1  ;;  %v1333_v28 = vadd.f32 %v1332_v32, %v1331_v52  ;;  %v1357_v30 = vadd.f32 %v1356_v10, %v1355_v56  ;;  %v1197_v34 = vrot.slane %v1196_v31, 1 }
 0x174   : > { %3528 = vst [vmem:[#allocation24_spill] sm:$0xff] %v3078_v55  ;;  %v1326_v0 = vadd.f32 %v1325_v37, %v2831_v25  ;;  %v1370_v8 = vrot.slane %v1369_v40, 1  ;;  %v3086_v18 = vadd.f32 %v1775_v22, %v1774_v17  ;;  %v1341_v12 = vadd.f32 %v1340_v7, %v1339_v41 }
 0x175   : > { %1429 = vrot.lane.b32.xlu0 %v1364_v1, %s2229_s4  ;;  %v3529_v3 = vrot.slane %v2873_v4, 2  ;;  %v1376_v2 = vadd.f32 %v1375_v38, %v2890_v24  ;;  %1427 = vrot.lane.b32.xlu1 %v1357_v30, %s2229_s4  ;;  %v1556_v25 = vadd.f32 %v1555_v11, %v2888_v58  ;;  %v3530_v56 = vrot.slane %v2865_v44, 2 }
 0x176   : > { %v3093_v51 = vpop.permute.xlu0 %426  ;;  %v1396_v17 = vrot.slane %v2938_v13, 2  ;;  %v1205_v41 = vadd.f32 %v1204_v45, %v1203_v62  ;;  %v3531_v24 = vrot.slane %v2913_v47, 2  ;;  %v3532_v32 = vrot.slane %v2859_v42, 2 }
 0x177   : > { %v1383_v46 = vadd.f32 %v3529_v3, %v2873_v4  ;;  %v1549_v52 = vadd.f32 %v3530_v56, %v2865_v44  ;;  %v3102_v37 = vpop.permute.xlu1 %621  ;;  %v1334_v4 = vrot.slane %v1333_v28, 1  ;;  %v1198_v30 = vadd.f32 %v1197_v34, %v1196_v31 }
 0x178   : > { %v1390_v63 = vadd.f32 %v3531_v24, %v2913_v47  ;;  %v1563_v10 = vadd.f32 %v3532_v32, %v2859_v42  ;;  %v1327_v58 = vrot.slane %v1326_v0, 1  ;;  %v1371_v22 = vadd.f32 %v1370_v8, %v1369_v40 }
 0x179   : > { %v3533_v44 = vrot.slane %v2905_v19, 2  ;;  %1240 = vrot.lane.b32.xlu0 %v1205_v41, %s2228_s3  ;;  %v1342_v38 = vrot.slane %v1341_v12, 1  ;;  %v1384_v62 = vrot.slane %v1383_v46, 1  ;;  %v1377_v11 = vrot.slane %v1376_v2, 1  ;;  %1238 = vrot.lane.b32.xlu1 %v1198_v30, %s2228_s3 }
 0x17a   : > { %v1397_v1 = vadd.f32 %v1396_v17, %v2938_v13  ;;  %v3115_v45 = vpop.permute.xlu0 %615  ;;  %v1557_v47 = vrot.slane %v1556_v25, 1  ;;  %v1550_v42 = vrot.slane %v1549_v52, 1  ;;  %v1533_v34 = vrot.slane %v2901_v14, 2 }
 0x17b   : > { %v1404_v7 = vadd.f32 %v3533_v44, %v2905_v19  ;;  %v3534_v31 = vrot.slane %v2886_v43, 2  ;;  %v3122_v19 = vpop.permute.xlu1 %633  ;;  %v1335_v8 = vadd.f32 %v1334_v4, %v1333_v28  ;;  %v1391_v3 = vrot.slane %v1390_v63, 1 }
 0x17c   : > { %v1564_v56 = vrot.slane %v1563_v10, 1  ;;  %v3535_v13 = vrot.slane %v2960_v61, 2  ;;  %v1328_v41 = vadd.f32 %v1327_v58, %v1326_v0  ;;  %v3536_v32 = vrot.slane %v2896_v53, 2 }
 0x17d   : > { %v1527_v40 = vadd.f32 %v3534_v31, %v2886_v43  ;;  %v1405_v24 = vrot.slane %v1404_v7, 1  ;;  %v3537_v44 = vrot.slane %v2962_v21, 2  ;;  %v178_v43 = vld [vmem:[#allocation5 + $0x8] sm:$0xff]  ;;  %1421 = vrot.lane.b32.xlu0 %v1335_v8, %s2229_s4  ;;  %v1343_v28 = vadd.f32 %v1342_v38, %v1341_v12 }
 0x17e   : > { %v1570_v17 = vadd.f32 %v3535_v13, %v2960_v61  ;;  %v1542_v30 = vadd.f32 %v3536_v32, %v2896_v53  ;;  %v1385_v4 = vadd.f32 %v1384_v62, %v1383_v46  ;;  %v1378_v31 = vadd.f32 %v1377_v11, %v1376_v2  ;;  %v3134_v39 = vpop.permute.xlu0 %627  ;;  %v177_v61 = vld [vmem:[#allocation5] sm:$0xff]  ;;  %1419 = vrot.lane.b32.xlu1 %v1328_v41, %s2229_s4 }
 0x17f   : > { %v1584_v48 = vadd.f32 %v3537_v44, %v2962_v21  ;;  %v1398_v55 = vrot.slane %v1397_v1, 1  ;;  %v1558_v0 = vadd.f32 %v1557_v47, %v1556_v25  ;;  %v1551_v58 = vadd.f32 %v1550_v42, %v1549_v52  ;;  %v3138_v32 = vpop.permute.xlu1 %822 }
 0x180   : > { %v1534_v53 = vadd.f32 %v1533_v34, %v2901_v14  ;;  %v1528_v13 = vrot.slane %v1527_v40, 1  ;;  %v3140_v21 = vadd.f32 %v1391_v3, %v1390_v63  ;;  %v3142_v44 = vadd.f32 %v1564_v56, %v1563_v10 }
 0x181   : > { %v1571_v12 = vrot.slane %v1570_v17, 1  ;;  %v182_v46 = vmul.f32 %v2793_v20, %v178_v43  ;;  %v3145_v2 = vadd.f32 %v1405_v24, %v1404_v7  ;;  %v1543_v38 = vrot.slane %v1542_v30, 1  ;;  %1431 = vrot.lane.b32.xlu0 %v1371_v22, %s2229_s4  ;;  %v180_v22 = vld [vmem:[#allocation5 + $0x18] sm:$0xff] }
 0x182   : > { %v1585_v62 = vrot.slane %v1584_v48, 1  ;;  %v181_v11 = vmul.f32 %v2793_v20, %v177_v61  ;;  %v3149_v25 = vadd.f32 %v1398_v55, %v1397_v1  ;;  %v3151_v14 = vpop.permute.xlu0 %816  ;;  %v1576_v52 = vrot.slane %v2993_v50, 2  ;;  %1423 = vrot.lane.b32.xlu1 %v1343_v28, %s2229_s4 }
 0x183   : > { %v190_v63 = vcombine.high %v182_v46, %v182_v46  ;;  %v212_v10 = vsel %vm197_vm4, %v182_v46, 0.0  ;;  %v1535_v47 = vrot.slane %v1534_v53, 1  ;;  %v3156_v7 = vadd.f32 %v1528_v13, %v1527_v40  ;;  %v3158_v42 = vpop.permute.xlu1 %834 }
 0x184   : > { %v1756_v34 = vrot.slane %v2988_v6, 2  ;;  %v213_v8 = vrot.slane %v212_v10, 4  ;;  %v3161_v55 = vadd.f32 %v1571_v12, %v1570_v17  ;;  %v189_v3 = vcombine.high %v181_v11, %v181_v11 }
 0x185   : > { %v219_v1 = vsel %vm197_vm4, %v190_v63, 0.0  ;;  %v198_v56 = vsel %vm197_vm4, %v181_v11, 0.0  ;;  %v3165_v41 = vadd.f32 %v1543_v38, %v1542_v30  ;;  %1435 = vrot.lane.b32.xlu0 %v1385_v4, %s2229_s4  ;;  %v3168_v40 = vadd.f32 %v1585_v62, %v1584_v48  ;;  %v179_v4 = vld [vmem:[#allocation5 + $0x10] sm:$0xff] }
 0x186   : > { %v214_v24 = vadd.f32 %v213_v8, %v212_v10  ;;  %v220_v43 = vrot.slane %v219_v1, 4  ;;  %v199_v28 = vrot.slane %v198_v56, 4  ;;  %v3171_v61 = vadd.f32 %v1576_v52, %v2993_v50  ;;  %v3173_v13 = vpop.permute.xlu0 %828  ;;  %1433 = vrot.lane.b32.xlu1 %v1378_v31, %s2229_s4 }
 0x187   : > { %v205_v17 = vsel %vm197_vm4, %v189_v3, 0.0  ;;  %v184_v12 = vmul.f32 %v2793_v20, %v180_v22  ;;  %v3178_v30 = vpop.permute.xlu1 %1023  ;;  %v3180_v48 = vadd.f32 %v1535_v47, %v1534_v53  ;;  %vm438_vm10 = vcmask 1039360  }
 0x188   : > { %v215_v46 = vrot.slane %v214_v24, 2  ;;  %v221_v38 = vadd.f32 %v220_v43, %v219_v1  ;;  %v200_v11 = vadd.f32 %v199_v28, %v198_v56  ;;  %v206_v63 = vrot.slane %v205_v17, 4 }
 0x189   : > { %v192_v50 = vcombine.high %v184_v12, %v184_v12  ;;  %v240_v62 = vsel %vm197_vm4, %v184_v12, 0.0  ;;  %1628 = vrot.lane.b32.xlu0 %v1558_v0, %s2230_s5  ;;  %v3185_v31 = vadd.f32 %v1756_v34, %v2988_v6  ;;  %v3538_v22 = vrot.slane %v2949_v57, 2 }
 0x18a   : > { %v216_v52 = vadd.f32 %v215_v46, %v214_v24  ;;  %v222_v10 = vrot.slane %v221_v38, 2  ;;  %v201_v8 = vrot.slane %v200_v11, 2  ;;  %v207_v3 = vadd.f32 %v206_v63, %v205_v17  ;;  %v3192_v53 = vpop.permute.xlu0 %1017  ;;  %1626 = vrot.lane.b32.xlu1 %v1551_v58, %s2230_s5 }
 0x18b   : > { %v3190_v1 = vadd.f32 %v3538_v22, %v2949_v57  ;;  %3539 = vst [vmem:[#allocation25_spill] sm:$0xff] %v3192_v53  ;;  %v241_v47 = vrot.slane %v240_v62, 4  ;;  %v183_v56 = vmul.f32 %v2793_v20, %v179_v4  ;;  %v3540_v24 = vrot.slane %v2980_v29, 2  ;;  %v417_v6 = vpop.permute.xlu1 %416 }
 0x18c   : > { %v223_v0 = vadd.f32 %v222_v10, %v221_v38  ;;  %v208_v34 = vrot.slane %v207_v3, 2  ;;  %v247_v28 = vsel %vm197_vm4, %v192_v50, 0.0  ;;  %v217_v17 = vrot.slane %v216_v52, 1 }
 0x18d   : > { %v3199_v43 = vadd.f32 %v3540_v24, %v2980_v29  ;;  %v3204_v57 = vsel %vm438_vm10, %v3072_v26, %v417_v6  ;;  %v3208_v20 = vsel %vm438_vm10, %v417_v6, %v2935_v60  ;;  %v242_v58 = vadd.f32 %v241_v47, %v240_v62  ;;  %1437 = vrot.lane.b32.xlu0 %v3140_v21, %s2229_s4 }
 0x18e   : > { %v1578_v12 = vrot.slane %v3171_v61, 1  ;;  %v224_v46 = vrot.slane %v223_v0, 1  ;;  %v202_v29 = vadd.f32 %v201_v8, %v200_v11  ;;  %v209_v63 = vadd.f32 %v208_v34, %v207_v3  ;;  %v423_v38 = vpop.permute.xlu0 %422  ;;  %1630 = vrot.lane.b32.xlu1 %v3142_v44, %s2230_s5 }
 0x18f   : > { %v243_v4 = vrot.slane %v242_v58, 2  ;;  %v248_v50 = vrot.slane %v247_v28, 4  ;;  %v191_v10 = vcombine.high %v183_v56, %v183_v56  ;;  %v226_v26 = vsel %vm197_vm4, %v183_v56, 0.0  ;;  %v429_v8 = vpop.permute.xlu1 %428 }
 0x190   : > { %v3541_v62 = vrot.slane %v2942_v16, 2  ;;  %v441_v11 = vsel %vm438_vm10, %v3063_v36, %v423_v38  ;;  %v442_v21 = vsel %vm438_vm10, %v423_v38, %v2945_v54  ;;  %v1751_v3 = vrot.slane %v3190_v1, 1 }
 0x191   : > { %v218_v47 = vadd.f32 %v217_v17, %v216_v52  ;;  %v244_v56 = vadd.f32 %v243_v4, %v242_v58  ;;  %v249_v24 = vadd.f32 %v248_v50, %v247_v28  ;;  %v203_v44 = vrot.slane %v202_v29, 1  ;;  %1441 = vrot.lane.b32.xlu0 %v3145_v2, %s2229_s4 }
 0x192   : > { %v3220_v22 = vadd.f32 %v3541_v62, %v2942_v16  ;;  %v210_v6 = vrot.slane %v209_v63, 1  ;;  %v227_v34 = vrot.slane %v226_v26, 4  ;;  %v233_v60 = vsel %vm197_vm4, %v191_v10, 0.0  ;;  %v435_v62 = vpop.permute.xlu0 %434  ;;  %1439 = vrot.lane.b32.xlu1 %v3149_v25, %s2229_s4  ;;  %v3542_v10 = vld [vmem:[#allocation11_spill] sm:$0xff] }
 0x193   : > { %v225_v16 = vadd.f32 %v224_v46, %v223_v0  ;;  %v245_v36 = vrot.slane %v244_v56, 1  ;;  %v250_v33 = vrot.slane %v249_v24, 2  ;;  %v234_v53 = vrot.slane %v233_v60, 4  ;;  %v618_v58 = vpop.permute.xlu1 %617 }
 0x194   : > { %v445_v54 = vsel %vm438_vm10, %v3082_v27, %v435_v62  ;;  %v446_v52 = vsel %vm438_vm10, %v435_v62, %v2957_v9  ;;  %v228_v28 = vadd.f32 %v227_v34, %v226_v26  ;;  %v443_v17 = vsel %vm438_vm10, %v3093_v51, %v429_v8 }
 0x195   : > { %v1579_v2 = vadd.f32 %v1578_v12, %v3171_v61  ;;  %v1597_v0 = vrot.slane %v3008_v35, 2  ;;  %v251_v46 = vadd.f32 %v250_v33, %v249_v24  ;;  %v235_v38 = vadd.f32 %v234_v53, %v233_v60  ;;  %1622 = vrot.lane.b32.xlu0 %v3180_v48, %s2230_s5 }
 0x196   : > { %v204_v4 = vadd.f32 %v203_v44, %v202_v29  ;;  %v211_v50 = vadd.f32 %v210_v6, %v209_v63  ;;  %v229_v25 = vrot.slane %v228_v28, 2  ;;  %v444_v27 = vsel %vm438_vm10, %v429_v8, %v3542_v10  ;;  %v624_v51 = vpop.permute.xlu0 %623  ;;  %1620 = vrot.lane.b32.xlu1 %v3156_v7, %s2230_s5 }
 0x197   : > { %v457_v9 = vadd.f32 %v441_v11, %v218_v47  ;;  %v252_v26 = vrot.slane %v251_v46, 1  ;;  %v236_v34 = vrot.slane %v235_v38, 2  ;;  %vm639_vm4 = vcmask 1031168  }
 0x198   : > { %v458_v61 = vadd.f32 %v442_v21, %v225_v16  ;;  %v246_v33 = vadd.f32 %v245_v36, %v244_v56  ;;  %v230_v53 = vadd.f32 %v229_v25, %v228_v28  ;;  %v642_v12 = vsel %vm639_vm4, %v3102_v37, %v624_v51 }
 0x199   : > { %v630_v29 = vpop.permute.xlu1 %629  ;;  %v253_v63 = vadd.f32 %v252_v26, %v251_v46  ;;  %v237_v60 = vadd.f32 %v236_v34, %v235_v38  ;;  %v643_v48 = vsel %vm639_vm4, %v624_v51, %v2986_v59  ;;  %v658_v11 = vadd.f32 %v642_v12, %v457_v9  ;;  %1632 = vrot.lane.b32.xlu0 %v3161_v55, %s2230_s5  ;;  %v3544_v38 = vld [vmem:[#allocation16_spill] sm:$0xff] }
 0x19a   : > { %v455_v8 = vadd.f32 %v3204_v57, %v204_v4  ;;  %v456_v47 = vadd.f32 %v3208_v20, %v211_v50  ;;  %v231_v24 = vrot.slane %v230_v53, 1  ;;  %v659_v44 = vadd.f32 %v643_v48, %v458_v61  ;;  %v636_v6 = vpop.permute.xlu0 %635  ;;  %1624 = vrot.lane.b32.xlu1 %v3165_v41, %s2230_s5  ;;  %v3546_v50 = vld [vmem:[#allocation14_spill] sm:$0xff] }
 0x19b   : > { %v3543_v7 = vrot.slane %v2982_v23, 2  ;;  %v238_v21 = vrot.slane %v237_v60, 1  ;;  %v640_v56 = vsel %vm639_vm4, %v3115_v45, %v618_v58  ;;  %v641_v59 = vsel %vm639_vm4, %v618_v58, %v2976_v5 }
 0x19c   : > { %v461_v57 = vadd.f32 %v445_v54, %v246_v33  ;;  %v232_v20 = vadd.f32 %v231_v24, %v230_v53  ;;  %v656_v16 = vadd.f32 %v640_v56, %v455_v8  ;;  %v657_v62 = vadd.f32 %v641_v59, %v456_v47  ;;  %v3549_v33 = vld [vmem:[#allocation18_spill] sm:$0xff] }
 0x19d   : > { %v1605_v37 = vadd.f32 %v3543_v7, %v2982_v23  ;;  %v819_v55 = vpop.permute.xlu1 %818  ;;  %v1598_v36 = vadd.f32 %v1597_v0, %v3008_v35  ;;  %v462_v28 = vadd.f32 %v446_v52, %v253_v63  ;;  %v239_v23 = vadd.f32 %v238_v21, %v237_v60  ;;  %1636 = vrot.lane.b32.xlu0 %v3168_v40, %s2230_s5  ;;  %v3550_v63 = vld [vmem:[#allocation17_spill] sm:$0xff] }
 0x19e   : > { %v646_v46 = vsel %vm639_vm4, %v3122_v19, %v636_v6  ;;  %v459_v45 = vadd.f32 %v443_v17, %v232_v20  ;;  %v647_v5 = vsel %vm639_vm4, %v636_v6, %v3544_v38  ;;  %v644_v41 = vsel %vm639_vm4, %v3134_v39, %v630_v29  ;;  %v825_v17 = vpop.permute.xlu0 %824  ;;  %1634 = vrot.lane.b32.xlu1 %v1579_v2, %s2230_s5  ;;  %v3547_v39 = vld [vmem:[#allocation15_spill] sm:$0xff] }
 0x19f   : > { %v662_v58 = vadd.f32 %v646_v46, %v461_v57  ;;  %v3545_v54 = vrot.slane %v3057_v49, 2  ;;  %v1592_v35 = vrot.slane %v3199_v43, 1  ;;  %v460_v52 = vadd.f32 %v444_v27, %v239_v23  ;;  %v3553_v57 = vld [vmem:[#allocation19_spill] sm:$0xff]  ;;  %v3554_v23 = vld [vmem:[#allocation13_spill] sm:$0xff] }
 0x1a0   : > { %v663_v19 = vadd.f32 %v647_v5, %v462_v28  ;;  %v1765_v0 = vrot.slane %v3220_v22, 1  ;;  %v1734_v25 = vrot.slane %v3546_v50, 2  ;;  %v645_v10 = vsel %vm639_vm4, %v630_v29, %v3547_v39  ;;  %v3556_v5 = vld [vmem:[#allocation25_spill] sm:$0xff]  ;;  %v3560_v39 = vld [vmem:[#allocation20_spill] sm:$0xff] }
 0x1a1   : > { %v3273_v4 = vadd.f32 %v3545_v54, %v3057_v49  ;;  %v660_v9 = vadd.f32 %v644_v41, %v459_v45  ;;  %v831_v49 = vpop.permute.xlu1 %830  ;;  %v3548_v26 = vrot.slane %v3185_v31, 1  ;;  %v1752_v27 = vadd.f32 %v1751_v3, %v3190_v1 }
 0x1a2   : > { %v661_v34 = vadd.f32 %v645_v10, %v460_v52  ;;  %vm840_vm11 = vcmask 916480   ;;  %v1606_v2 = vrot.slane %v1605_v37, 1  ;;  %v1599_v51 = vrot.slane %v1598_v36, 1  ;;  %v837_v3 = vpop.permute.xlu0 %836 }
 0x1a3   : > { %v1759_v40 = vadd.f32 %v3548_v26, %v3185_v31  ;;  %v843_v61 = vsel %vm840_vm11, %v3138_v32, %v825_v17  ;;  %v844_v53 = vsel %vm840_vm11, %v825_v17, %v3549_v33  ;;  %v841_v31 = vsel %vm840_vm11, %v3151_v14, %v819_v55  ;;  %1827 = vrot.lane.b32.xlu1 %v1752_v27, %s2231_s8  ;;  %v3551_v32 = vld [vmem:[#allocation12_spill] sm:$0xff] }
 0x1a4   : > { %v859_v12 = vadd.f32 %v843_v61, %v658_v11  ;;  %v860_v29 = vadd.f32 %v844_v53, %v659_v44  ;;  %v842_v1 = vsel %vm840_vm11, %v819_v55, %v3550_v63  ;;  %v1735_v60 = vadd.f32 %v1734_v25, %v3546_v50  ;;  %v3562_v26 = vld [vmem:[#allocation24_spill] sm:$0xff] }
 0x1a5   : > { %1829 = vrot.lane.b32.xlu0 %v1759_v40, %s2231_s8  ;;  %v3552_v48 = vrot.slane %v3551_v32, 2  ;;  %v857_v47 = vadd.f32 %v841_v31, %v656_v16  ;;  %v858_v24 = vadd.f32 %v842_v1, %v657_v62  ;;  %v1020_v7 = vpop.permute.xlu1 %1019  ;;  %v1593_v11 = vadd.f32 %v1592_v35, %v3199_v43 }
 0x1a6   : > { %v847_v14 = vsel %vm840_vm11, %v3158_v42, %v837_v3  ;;  %v848_v44 = vsel %vm840_vm11, %v837_v3, %v3045_v15  ;;  %v845_v21 = vsel %vm840_vm11, %v3173_v13, %v831_v49  ;;  %v1766_v56 = vadd.f32 %v1765_v0, %v3220_v22  ;;  %v1026_v55 = vpop.permute.xlu0 %1025  ;;  %v3558_v0 = vld [vmem:[#allocation22_spill] sm:$0xff] }
 0x1a7   : > { %v1728_v8 = vadd.f32 %v3552_v48, %v3551_v32  ;;  %v863_v59 = vadd.f32 %v847_v14, %v662_v58  ;;  %v3311_v6 = vadd.f32 %v848_v44, %v663_v19  ;;  %v846_v20 = vsel %vm840_vm11, %v831_v49, %v3553_v57  ;;  %v3557_v58 = vld [vmem:[#allocation21_spill] sm:$0xff] }
 0x1a8   : > { %v1777_v16 = vrot.slane %v3086_v18, 2  ;;  %v1607_v43 = vadd.f32 %v1606_v2, %v1605_v37  ;;  %v861_v42 = vadd.f32 %v845_v21, %v660_v9  ;;  %v862_v62 = vadd.f32 %v846_v20, %v661_v34  ;;  %1831 = vrot.lane.b32.xlu1 %v1766_v56, %s2231_s8 }
 0x1a9   : > { %1638 = vrot.lane.b32.xlu0 %v1593_v11, %s2230_s5  ;;  %v1600_v15 = vadd.f32 %v1599_v51, %v1598_v36  ;;  %v1736_v13 = vrot.slane %v1735_v60, 1  ;;  %v1729_v28 = vrot.slane %v1728_v8, 1  ;;  %vm1041_vm12 = vcmask 908288   ;;  %v1028_v22 = vpop.permute.xlu1 %1027 }
 0x1aa   : > { %v3555_v46 = vrot.slane %v3554_v23, 2  ;;  %v1044_v38 = vsel %vm1041_vm12, %v3178_v30, %v1026_v55  ;;  %v1042_v37 = vsel %vm1041_vm12, %v3556_v5, %v1020_v7  ;;  %v1043_v41 = vsel %vm1041_vm12, %v1020_v7, %v3557_v58  ;;  %v3559_v30 = vld [vmem:[#allocation23_spill] sm:$0xff] }
 0x1ab   : > { %v3327_v54 = vadd.f32 %v1044_v38, %v859_v12  ;;  %v1058_v36 = vadd.f32 %v1042_v37, %v857_v47  ;;  %v1059_v35 = vadd.f32 %v1043_v41, %v858_v24  ;;  %v1045_v52 = vsel %vm1041_vm12, %v1026_v55, %v1028_v22  ;;  %v1030_v19 = vpop.permute.xlu0 %1029 }
 0x1ac   : > { %v1743_v45 = vadd.f32 %v3555_v46, %v3554_v23  ;;  %v3331_v17 = vadd.f32 %v1045_v52, %v860_v29  ;;  %v1791_v50 = vrot.slane %v3558_v0, 2  ;;  %v1798_v25 = vrot.slane %v3559_v30, 2  ;;  %1640 = vrot.lane.b32.xlu1 %v1600_v15, %s2230_s5 }
 0x1ad   : > { %1642 = vrot.lane.b32.xlu0 %v1607_v43, %s2230_s5  ;;  %v3561_v10 = vrot.slane %v3560_v39, 4  ;;  %v1032_v49 = vpop.permute.xlu1 %1031  ;;  %v3563_v40 = vrot.slane %v3562_v26, 2  ;;  %v1737_v34 = vadd.f32 %v1736_v13, %v1735_v60  ;;  %v1772_v2 = vrot.slane %v3273_v4, 1 }
 0x1ae   : > { %v1046_v51 = vsel %vm1041_vm12, %v1030_v19, %v1032_v49  ;;  %v1730_v61 = vadd.f32 %v1729_v28, %v1728_v8  ;;  %v1744_v33 = vrot.slane %v1743_v45, 1  ;;  %v1778_v53 = vadd.f32 %v1777_v16, %v3086_v18 }
 0x1af   : > { %v1804_v9 = vadd.f32 %v3561_v10, %v3560_v39  ;;  %v1785_v27 = vadd.f32 %v3563_v40, %v3562_v26  ;;  %v1062_v12 = vadd.f32 %v1046_v51, %v861_v42  ;;  %v1034_v29 = vpop.permute.xlu0 %1033  ;;  %v1773_v63 = vadd.f32 %v1772_v2, %v3273_v4 }
 0x1b0   : > { %1821 = vrot.lane.b32.xlu1 %v1730_v61, %s2231_s8  ;;  %v1047_v31 = vsel %vm1041_vm12, %v1032_v49, %v1034_v29  ;;  %v1799_v3 = vadd.f32 %v1798_v25, %v3559_v30  ;;  %v1792_v48 = vadd.f32 %v1791_v50, %v3558_v0  ;;  %v1745_v47 = vadd.f32 %v1744_v33, %v1743_v45 }
 0x1b1   : > { %1823 = vrot.lane.b32.xlu0 %v1737_v34, %s2231_s8  ;;  %v1786_v1 = vrot.slane %v1785_v27, 1  ;;  %v1063_v60 = vadd.f32 %v1047_v31, %v862_v62  ;;  %v1036_v32 = vpop.permute.xlu1 %1035  ;;  %v1805_v8 = vrot.slane %v1804_v9, 2  ;;  %v1779_v18 = vrot.slane %v1778_v53, 1 }
 0x1b2   : > { %v1800_v14 = vrot.slane %v1799_v3, 1  ;;  %v1793_v56 = vrot.slane %v1792_v48, 1  ;;  %vm1242_vm13 = vcmask 900096   ;;  %vm1443_vm14 = vcmask 785408  }
 0x1b3   : > { %v1038_v24 = vpop.permute.xlu0 %1037  ;;  %v1787_v11 = vadd.f32 %v1786_v1, %v1785_v27  ;;  %v1806_v44 = vadd.f32 %v1805_v8, %v1804_v9  ;;  %v1780_v21 = vadd.f32 %v1779_v18, %v1778_v53  ;;  %vm1644_vm15 = vcmask 777216  }
 0x1b4   : > { %1825 = vrot.lane.b32.xlu1 %v1745_v47, %s2231_s8  ;;  %v1048_v7 = vsel %vm1041_vm12, %v1036_v32, %v1038_v24  ;;  %v1801_v57 = vadd.f32 %v1800_v14, %v1799_v3  ;;  %v1794_v20 = vadd.f32 %v1793_v56, %v1792_v48  ;;  %vm1845_vm0 = vcmask 769024  }
 0x1b5   : > { %1833 = vrot.lane.b32.xlu0 %v1773_v63, %s2231_s8  ;;  %v1064_v4 = vadd.f32 %v1048_v7, %v863_v59  ;;  %v1807_v16 = vrot.slane %v1806_v44, 1  ;;  %vm1883_vm1 = vcmask 1041409   ;;  %vm1885_vm2 = vcmask 1045509  }
 0x1b6   : > { %vm1888_vm3 = vcmask 1042434   ;;  %vm1890_vm5 = vcmask 1046534   ;;  %vm1893_vm6 = vcmask 1043459   ;;  %vm1895_vm7 = vcmask 1047559  }
 0x1b7   : > { %v1808_v59 = vadd.f32 %v1807_v16, %v1806_v44 }
 0x1b8   : > { %1835 = vrot.lane.b32.xlu1 %v1780_v21, %s2231_s8  ;;  %v1219_v55 = vpop.permute.xlu0 %1218 }
 0x1b9   : > { %1837 = vrot.lane.b32.xlu0 %v1787_v11, %s2231_s8 }
 0x1bb   : > { %v1040_v43 = vpop.permute.xlu1 %1039 }
 0x1bc   : > { %1839 = vrot.lane.b32.xlu1 %v1794_v20, %s2231_s8  ;;  %v1049_v42 = vsel %vm1041_vm12, %v1038_v24, %v1040_v43 }
 0x1bd   : > { %1841 = vrot.lane.b32.xlu0 %v1801_v57, %s2231_s8  ;;  %v3360_v62 = vadd.f32 %v1049_v42, %v3311_v6 }
 0x1c0   : > { %1843 = vrot.lane.b32.xlu1 %v1808_v59, %s2231_s8 }
 0x1c3   : > { %v1223_v15 = vpop.permute.xlu0 %1222 }
 0x1c5   : > { %v1221_v13 = vpop.permute.xlu1 %1220 }
 0x1c6   : > { %v1243_v28 = vsel %vm1242_vm13, %v1219_v55, %v1221_v13  ;;  %v1244_v22 = vsel %vm1242_vm13, %v1221_v13, %v1223_v15 }
 0x1c7   : > { %v3365_v23 = vadd.f32 %v1243_v28, %v1058_v36  ;;  %v3367_v46 = vadd.f32 %v1244_v22, %v1059_v35 }
 0x1cd   : > { %v1227_v45 = vpop.permute.xlu0 %1226  ;;  %v1225_v38 = vpop.permute.xlu1 %1224 }
 0x1ce   : > { %v1245_v6 = vsel %vm1242_vm13, %v1225_v38, %v1227_v45 }
 0x1cf   : > { %v1261_v5 = vadd.f32 %v1245_v6, %v3327_v54 }
 0x1d6   : > { %v1231_v37 = vpop.permute.xlu0 %1230 }
 0x1da   : > { %v1229_v58 = vpop.permute.xlu1 %1228 }
 0x1db   : > { %v1246_v41 = vsel %vm1242_vm13, %v1227_v45, %v1229_v58 }
 0x1dc   : > { %v1262_v52 = vadd.f32 %v1246_v41, %v3331_v17 }
 0x1df   : > { %v1235_v19 = vpop.permute.xlu0 %1234  ;;  %v1233_v0 = vpop.permute.xlu1 %1232 }
 0x1e0   : > { %v1247_v50 = vsel %vm1242_vm13, %v1231_v37, %v1233_v0  ;;  %v1248_v36 = vsel %vm1242_vm13, %v1233_v0, %v1235_v19 }
 0x1e1   : > { %v3375_v35 = vadd.f32 %v1247_v50, %v1062_v12  ;;  %v3377_v30 = vadd.f32 %v1248_v36, %v1063_v60 }
 0x1e3   : > { %v1426_v25 = vpop.permute.xlu0 %1425  ;;  %v1237_v39 = vpop.permute.xlu1 %1236 }
 0x1e7   : > { %v1430_v54 = vpop.permute.xlu0 %1429  ;;  %v1428_v10 = vpop.permute.xlu1 %1427 }
 0x1e8   : > { %v1446_v9 = vsel %vm1443_vm14, %v1426_v25, %v1428_v10  ;;  %v1447_v49 = vsel %vm1443_vm14, %v1428_v10, %v1430_v54 }
 0x1e9   : > { %v1462_v17 = vadd.f32 %v1446_v9, %v1261_v5  ;;  %v1463_v26 = vadd.f32 %v1447_v49, %v1262_v52 }
 0x1eb   : > { %v3381_v40 = vpop.permute.xlu0 %1240  ;;  %v3383_v27 = vpop.permute.xlu1 %1238 }
 0x1ec   : > { %v1249_v34 = vsel %vm1242_vm13, %v1237_v39, %v3383_v27 }
 0x1ed   : > { %v3387_v2 = vadd.f32 %v1249_v34, %v1064_v4 }
 0x1ef   : > { %v1422_v51 = vpop.permute.xlu0 %1421 }
 0x1f0   : > { %v1420_v61 = vpop.permute.xlu1 %1419 }
 0x1f1   : > { %v1444_v28 = vsel %vm1443_vm14, %v1420_v61, %v1422_v51 }
 0x1f2   : > { %v1460_v37 = vadd.f32 %v1444_v28, %v3365_v23 }
 0x1f3   : > { %v1432_v33 = vpop.permute.xlu0 %1431 }
 0x1f4   : > { %v1424_v53 = vpop.permute.xlu1 %1423 }
 0x1f5   : > { %v1445_v22 = vsel %vm1443_vm14, %v1422_v51, %v1424_v53  ;;  %v1250_v53 = vsel %vm1242_vm13, %v3383_v27, %v3381_v40 }
 0x1f6   : > { %v1461_v58 = vadd.f32 %v1445_v22, %v3367_v46 }
 0x1f7   : > { %v1436_v12 = vpop.permute.xlu0 %1435 }
 0x1f8   : > { %v1434_v29 = vpop.permute.xlu1 %1433 }
 0x1f9   : > { %v1448_v41 = vsel %vm1443_vm14, %v1432_v33, %v1434_v29  ;;  %v1449_v52 = vsel %vm1443_vm14, %v1434_v29, %v1436_v12 }
 0x1fa   : > { %v1464_v23 = vadd.f32 %v1448_v41, %v3375_v35  ;;  %v1465_v46 = vadd.f32 %v1449_v52, %v3377_v30 }
 0x1fb   : > { %v1629_v31 = vpop.permute.xlu0 %1628 }
 0x1fc   : > { %v1627_v63 = vpop.permute.xlu1 %1626 }
 0x1fd   : > { %v1647_v4 = vsel %vm1644_vm15, %v1627_v63, %v1629_v31 }
 0x1fe   : > { %v1663_v57 = vadd.f32 %v1647_v4, %v1462_v17 }
 0x1ff   : > { %v3389_v1 = vpop.permute.xlu0 %1437 }
 0x200   : > { %v1631_v3 = vpop.permute.xlu1 %1630 }
 0x201   : > { %v1648_v44 = vsel %vm1644_vm15, %v1629_v31, %v1631_v3 }
 0x202   : > { %v1664_v20 = vadd.f32 %v1648_v44, %v1463_v26 }
 0x203   : > { %v3391_v60 = vpop.permute.xlu0 %1441 }
 0x204   : > { %v1440_v32 = vpop.permute.xlu1 %1439 }
 0x205   : > { %v1450_v63 = vsel %vm1443_vm14, %v3389_v1, %v1440_v32  ;;  %v1451_v3 = vsel %vm1443_vm14, %v1440_v32, %v3391_v60 }
 0x207   : > { %v1623_v48 = vpop.permute.xlu0 %1622 }
 0x208   : > { %v1621_v8 = vpop.permute.xlu1 %1620 }
 0x209   : > { %v1645_v6 = vsel %vm1644_vm15, %v1621_v8, %v1623_v48  ;;  %v1266_v8 = vadd.f32 %v1250_v53, %v3360_v62 }
 0x20a   : > { %v1661_v50 = vadd.f32 %v1645_v6, %v1460_v37 }
 0x20b   : > { %v1633_v47 = vpop.permute.xlu0 %1632 }
 0x20c   : > { %v1625_v18 = vpop.permute.xlu1 %1624 }
 0x20d   : > { %v1646_v5 = vsel %vm1644_vm15, %v1623_v48, %v1625_v18 }
 0x20e   : > { %v1662_v36 = vadd.f32 %v1646_v5, %v1461_v58 }
 0x20f   : > { %v1637_v24 = vpop.permute.xlu0 %1636 }
 0x210   : > { %v1635_v7 = vpop.permute.xlu1 %1634 }
 0x211   : > { %v1649_v39 = vsel %vm1644_vm15, %v1633_v47, %v1635_v7  ;;  %v1650_v54 = vsel %vm1644_vm15, %v1635_v7, %v1637_v24  ;;  %v1466_v7 = vadd.f32 %v1450_v63, %v3387_v2 }
 0x212   : > { %v1665_v26 = vadd.f32 %v1649_v39, %v1464_v23  ;;  %v1666_v34 = vadd.f32 %v1650_v54, %v1465_v46 }
 0x215   : > { %v1828_v14 = vpop.permute.xlu1 %1827 }
 0x217   : > { %v1830_v11 = vpop.permute.xlu0 %1829 }
 0x218   : > { %v1848_v21 = vsel %vm1845_vm0, %v1828_v14, %v1830_v11 }
 0x219   : > { %v1864_v42 = vadd.f32 %v1848_v21, %v1663_v57 }
 0x21a   : > { %v1832_v16 = vpop.permute.xlu1 %1831 }
 0x21b   : > { %v1639_v56 = vpop.permute.xlu0 %1638  ;;  %v1849_v43 = vsel %vm1845_vm0, %v1830_v11, %v1832_v16  ;;  %v1467_v11 = vadd.f32 %v1451_v3, %v1266_v8 }
 0x21c   : > { %v1865_v59 = vadd.f32 %v1849_v43, %v1664_v20 }
 0x21e   : > { %v1879_v15 = vcombine.low %v1864_v42, %v1865_v59  ;;  %v1641_v13 = vpop.permute.xlu1 %1640 }
 0x21f   : > { %v1643_v55 = vpop.permute.xlu0 %1642  ;;  %v1651_v27 = vsel %vm1644_vm15, %v1639_v56, %v1641_v13 }
 0x220   : > { %v1882_v51 = vrot.slane %v1879_v15, 7  ;;  %v1652_v24 = vsel %vm1644_vm15, %v1641_v13, %v1643_v55  ;;  %v1667_v60 = vadd.f32 %v1651_v27, %v1466_v7 }
 0x221   : > { %v1668_v32 = vadd.f32 %v1652_v24, %v1467_v11 }
 0x222   : > { %v1822_v38 = vpop.permute.xlu1 %1821 }
 0x223   : > { %v1824_v45 = vpop.permute.xlu0 %1823 }
 0x224   : > { %v1846_v19 = vsel %vm1845_vm0, %v1822_v38, %v1824_v45 }
 0x225   : > { %v1862_v9 = vadd.f32 %v1846_v19, %v1661_v50 }
 0x226   : > { %v1826_v25 = vpop.permute.xlu1 %1825 }
 0x227   : > { %v1834_v0 = vpop.permute.xlu0 %1833  ;;  %v1847_v10 = vsel %vm1845_vm0, %v1824_v45, %v1826_v25 }
 0x228   : > { %v1863_v49 = vadd.f32 %v1847_v10, %v1662_v36 }
 0x22a   : > { %v1878_v61 = vcombine.low %v1862_v9, %v1863_v49  ;;  %v1836_v33 = vpop.permute.xlu1 %1835 }
 0x22b   : > { %v1838_v17 = vpop.permute.xlu0 %1837  ;;  %v1850_v12 = vsel %vm1845_vm0, %v1834_v0, %v1836_v33 }
 0x22c   : > { %v1851_v35 = vsel %vm1845_vm0, %v1836_v33, %v1838_v17  ;;  %v1884_v29 = vsel %vm1883_vm1, %v1882_v51, %v1878_v61  ;;  %v1866_v30 = vadd.f32 %v1850_v12, %v1665_v26 }
 0x22d   : > { %v1867_v31 = vadd.f32 %v1851_v35, %v1666_v34  ;;  %v1886_v48 = vsel %vm1885_vm2, %v1882_v51, %v1884_v29 }
 0x22e   : > { %v1840_v40 = vpop.permute.xlu1 %1839 }
 0x22f   : > { %v1880_v47 = vcombine.low %v1866_v30, %v1867_v31  ;;  %v1842_v18 = vpop.permute.xlu0 %1841 }
 0x230   : > { %v1852_v14 = vsel %vm1845_vm0, %v1840_v40, %v1842_v18 }
 0x231   : > { %v1887_v1 = vrot.slane %v1880_v47, 6  ;;  %v1868_v56 = vadd.f32 %v1852_v14, %v1667_v60 }
 0x232   : > { %v1844_v4 = vpop.permute.xlu1 %1843 }
 0x233   : > { %v1889_v62 = vsel %vm1888_vm3, %v1887_v1, %v1886_v48  ;;  %v1853_v21 = vsel %vm1845_vm0, %v1842_v18, %v1844_v4 }
 0x234   : > { %v1891_v44 = vsel %vm1890_vm5, %v1887_v1, %v1889_v62  ;;  %v1869_v57 = vadd.f32 %v1853_v21, %v1668_v32 }
 0x236   : > { %v1881_v20 = vcombine.low %v1868_v56, %v1869_v57 }
 0x238   : > { %v1892_v2 = vrot.slane %v1881_v20, 5 }
 0x23a   : > { %v1894_v16 = vsel %vm1893_vm6, %v1892_v2, %v1891_v44 }
 0x23b   : > { %v1896_v43 = vsel %vm1895_vm7, %v1892_v2, %v1894_v16 }
 0x23c   : > { %1898 = vst [vmem:[%s174_s17] sm:$0xff] %v1896_v43 }
 0x23d   : > { %2155 = shalt.err (!%p2152_p0)
}
 0x23e   : > { %s2156_s26 = scalar_lea.hbm %s3431_s19, 128  ;;  %s2160_s28 = scalar_lea.hbm %s3470_s2, 256 }
 0x23f   : > { %p2157_p11 = scmp.ne.s32.totalorder %s3431_s19, %s2156_s26  ;;  %p2161_p1 = scmp.lt.s32.totalorder %s3431_s19, %s3470_s2 }
 0x240   : > { %p2162_p4 = scmp.lt.s32.totalorder %s2160_s28, %s2156_s26 }
 0x241   : > { %p2158_p9 = pnand %p2157_p11, %p3564_p3 }
 0x242   : > { %p2163_p6 = por %p2162_p4, %p2161_p1 }
 0x243   : > { %p2159_p12 = pneg %p2158_p9 }
 0x245   : > { %p2164_p8 = pnand %p2163_p6, %p2159_p12 }
 0x247   : > { %2167 = shalt.err (!%p2164_p8)
}
 0x248   : > { %2017 = dma.vmem_to_hbm [thread:$0]  (%p3564_p3), %s1915_s6, 128, %s3431_s19, %s1900_s20  }
 0x249 PF: > { %s1926_s5 = sand.u32 1, %s2198_s9   ;;  %p3565_p5 = scmp.ne.s32.totalorder %s3487_s16, 0 }
 0x24a   : > { %p3566_p7 = scmp.ge.s32.totalorder %s2210_s12, 2  ;;  %s1927_s8 = scalar_lea.sflag [#allocation4], %s1926_s5 }
 0x24c   : > { %p2028_p10 = pnand %p3566_p7, %p3565_p5 }
 0x24e   : > { %p2029_p2 = pneg %p2028_p10 }
 0x250   : > { %2193 = dma.done.wait (%p2029_p2), %s1927_s8, 128  }
 0x251   : > { %2195 = vsyncadd (%p2029_p2), %s1927_s8, 4294967168  ;;  %p16_p13 = scmp.ge.s32.totalorder %s2302_s21, 4   ;;  %s3567_s9 = smov %s2202_s10 }
 0x252   : > { %s3568_s10 = smov %s2206_s11  ;;  %s3569_s11 = smov %s2319_s29 }
 0x253   : > { %s3570_s12 = smov %s2302_s21  ;;  %18 = sbr.rel (!%p16_p13) target bundleno = 6 (0x6), region = 85 }
 0x258   :  { %1932 = vsyncpa [#allocation3], 1 }
 0x259   :  { %1934 = vsyncpa [#allocation3 + $0x1], 1 }
 0x25a   :  { %1935 = vsyncpa [#allocation6], 1 }
 0x25b   :  { %1936 = vsyncpa [#allocation4], 1 }
 0x25c   :  { %1938 = vsyncpa [#allocation4 + $0x1], 1 }

</bundles_post_ra>
